<compile_context>
chip_gen: v7x
topology: tpu7x:2x2x1
jax: 0.10.0
libtpu: 0.0.40
codegen_flags: <defaults>
</compile_context>

<pallas_src>
import math
import functools

import jax
import jax.numpy as jnp
from jax.experimental import pallas as pl
from jax.experimental.pallas import tpu as pltpu


# Matmul-input / inter-kernel activation dtype (accumulation stays f32).
COMPUTE_DTYPE = jnp.bfloat16
LANE = 128
_MIB = 1024 * 1024


def _round_up(x, m):
    return ((x + m - 1) // m) * m


def _tpu_defaults():
    """Generation-aware (scoped-VMEM limit bytes, row-tile target)."""
    try:
        vmem = int(getattr(pltpu.get_tpu_info(), "vmem_capacity_bytes", 64 * _MIB))
    except Exception:
        vmem = 64 * _MIB  # conservative (v7x-sized) fallback
    if vmem >= 128 * _MIB:
        # v5e / v6e: 128 MiB VMEM per TensorCore -> big tiles, high limit.
        return 96 * _MIB, 512
    # v7x: 64 MiB VMEM per TensorCore -> leave headroom for Mosaic scratch.
    return min(48 * _MIB, (vmem * 3) // 4), 256


VMEM_LIMIT_BYTES, TILE_M = _tpu_defaults()


def _compiler_params(grid_rank=1):
    return pltpu.CompilerParams(
        dimension_semantics=("parallel",) * grid_rank,
        vmem_limit_bytes=VMEM_LIMIT_BYTES,
    )


def _pick_row_tile(m, target=None):
    """Largest multiple-of-8 divisor of m that is <= target, preferring a split
    into >= 2 grid steps (keeps both v7x TensorCores busy / enables DMA
    pipelining).  Falls back to the full extent (always a legal block)."""
    target = TILE_M if target is None else target
    limit = min(target, m)
    cands = [d for d in range(8, limit + 1, 8) if m % d == 0]
    if not cands:
        return m
    split = [d for d in cands if d <= m // 2]
    return max(split) if split else max(cands)


# ------------------------- Pallas kernels -------------------------

def _linear_kernel(x_ref, w_ref, b_ref, o_ref, *, activation):
    acc = jnp.dot(x_ref[...], w_ref[...], preferred_element_type=jnp.float32)
    acc = acc + b_ref[...]
    if activation == "gelu":
        acc = jax.nn.gelu(acc, approximate=True)
    o_ref[...] = acc.astype(o_ref.dtype)


def _attn_block_kernel(x_ref, wqkv_ref, bqkv_ref, wproj_ref, bproj_ref,
                       g_ref, beta_ref, o_ref, *, heads, s_valid):
    """Per-batch fused: qkv proj + MHA + out-projection + residual + LayerNorm."""
    x = x_ref[...]                                   # (S_pad, D) bf16
    s_pad, dim = x.shape
    head_dim = dim // heads

    # qkv projection; attention scale 1/sqrt(head_dim) pre-folded into Wq/bq.
    qkv = jnp.dot(x, wqkv_ref[...], preferred_element_type=jnp.float32)
    qkv = (qkv + bqkv_ref[...]).astype(x.dtype)      # (S_pad, 3D)
    q = qkv[:, 0:dim]
    k = qkv[:, dim:2 * dim]
    v = qkv[:, 2 * dim:3 * dim]

    # Key mask for the zero-padded sequence rows (pad rows never contribute).
    if s_valid < s_pad:
        kmask = jax.lax.broadcasted_iota(jnp.int32, (s_pad, s_pad), 1) < s_valid
    else:
        kmask = None

    # TODO(synk): batch QK^T / PV across heads with one batched dot_general
    # ((H, S, Dh) layout) once in-kernel lane-split reshapes are guaranteed to
    # lower; a static unroll over heads is kept here for lowering robustness.
    ctx_heads = []
    for h in range(heads):
        sl = slice(h * head_dim, (h + 1) * head_dim)
        qh, kh, vh = q[:, sl], k[:, sl], v[:, sl]
        s = jax.lax.dot_general(qh, kh, (((1,), (1,)), ((), ())),
                                preferred_element_type=jnp.float32)   # (S, S)
        if kmask is not None:
            s = jnp.where(kmask, s, jnp.float32(-1e30))
        s = s - jnp.max(s, axis=-1, keepdims=True)
        p = jnp.exp(s)
        p = p * pl.reciprocal(jnp.sum(p, axis=-1, keepdims=True), approx=True)
        ctx_heads.append(
            jnp.dot(p.astype(vh.dtype), vh,
                    preferred_element_type=jnp.float32).astype(x.dtype))
    ctx = jnp.concatenate(ctx_heads, axis=-1)        # (S_pad, D) head concat

    # Single full-D-contraction output projection (full MXU utilization).
    y = jnp.dot(ctx, wproj_ref[...], preferred_element_type=jnp.float32)
    y = y + bproj_ref[...] + x.astype(jnp.float32)   # proj bias + residual
    mu = jnp.mean(y, axis=-1, keepdims=True)
    yc = y - mu
    var = jnp.mean(yc * yc, axis=-1, keepdims=True)
    o_ref[...] = (yc * jax.lax.rsqrt(var + 1e-5) * g_ref[...] + beta_ref[...]
                  ).astype(o_ref.dtype)


def _ffn_block_kernel(x_ref, w1_ref, b1_ref, w2_ref, b2_ref, g_ref, beta_ref,
                      o_ref):
    """Row-tiled fused: fc1 + GELU(tanh) + fc2 + residual + LayerNorm."""
    x = x_ref[...]
    h = jnp.dot(x, w1_ref[...], preferred_element_type=jnp.float32) + b1_ref[...]
    h = jax.nn.gelu(h, approximate=True)
    y = jnp.dot(h.astype(w2_ref.dtype), w2_ref[...],
                preferred_element_type=jnp.float32) + b2_ref[...]
    y = y + x.astype(jnp.float32)                    # residual
    mu = jnp.mean(y, axis=-1, keepdims=True)
    yc = y - mu
    var = jnp.mean(yc * yc, axis=-1, keepdims=True)
    o_ref[...] = (yc * jax.lax.rsqrt(var + 1e-5) * g_ref[...] + beta_ref[...]
                  ).astype(o_ref.dtype)


def _head_kernel(x_ref, g_ref, beta_ref, w_ref, b_ref, o_ref):
    """Fused LayerNorm + classifier linear (lane-padded, unmasked stores)."""
    x = x_ref[...].astype(jnp.float32)
    mu = jnp.mean(x, axis=-1, keepdims=True)
    xc = x - mu
    var = jnp.mean(xc * xc, axis=-1, keepdims=True)
    xn = xc * jax.lax.rsqrt(var + 1e-5) * g_ref[...] + beta_ref[...]
    o_ref[...] = (jnp.dot(xn.astype(w_ref.dtype), w_ref[...],
                          preferred_element_type=jnp.float32) + b_ref[...])


# ------------------------- Pallas wrappers -------------------------

def pallas_linear(x, w, b, *, activation=None, out_dtype=None):
    """x: (M, K) @ w: (K, N) + b -> (M, N); rows tiled over a 'parallel' grid."""
    m, k = x.shape
    n = w.shape[1]
    out_dtype = out_dtype if out_dtype is not None else x.dtype
    tile = _pick_row_tile(m)
    return pl.pallas_call(
        functools.partial(_linear_kernel, activation=activation),
        out_shape=jax.ShapeDtypeStruct((m, n), out_dtype),
        grid=(m // tile,),
        in_specs=[
            pl.BlockSpec((tile, k), lambda i: (i, 0)),
            pl.BlockSpec((k, n), lambda i: (0, 0)),     # resident weight block
            pl.BlockSpec((1, n), lambda i: (0, 0)),
        ],
        out_specs=pl.BlockSpec((tile, n), lambda i: (i, 0)),
        compiler_params=_compiler_params(1),
    )(x, w, b.reshape(1, n))


def pallas_attention_block(x, wqkv, bqkv, wproj, bproj, ln_g, ln_b, *, heads,
                           s_valid):
    """x: (B, S_pad, D) -> (B, S_pad, D); one batch element per grid step."""
    bsz, s_pad, dim = x.shape
    return pl.pallas_call(
        functools.partial(_attn_block_kernel, heads=heads, s_valid=s_valid),
        out_shape=jax.ShapeDtypeStruct((bsz, s_pad, dim), x.dtype),
        grid=(bsz,),
        in_specs=[
            pl.BlockSpec((pl.Squeezed(), s_pad, dim), lambda b: (b, 0, 0)),
            pl.BlockSpec((dim, 3 * dim), lambda b: (0, 0)),
            pl.BlockSpec((1, 3 * dim), lambda b: (0, 0)),
            pl.BlockSpec((dim, dim), lambda b: (0, 0)),
            pl.BlockSpec((1, dim), lambda b: (0, 0)),
            pl.BlockSpec((1, dim), lambda b: (0, 0)),
            pl.BlockSpec((1, dim), lambda b: (0, 0)),
        ],
        out_specs=pl.BlockSpec((pl.Squeezed(), s_pad, dim), lambda b: (b, 0, 0)),
        compiler_params=_compiler_params(1),
    )(x, wqkv, bqkv.reshape(1, 3 * dim), wproj, bproj.reshape(1, dim),
      ln_g.reshape(1, dim), ln_b.reshape(1, dim))


def pallas_ffn_block(x, w1, b1, w2, b2, ln_g, ln_b):
    """x: (M, D) -> LN(x + fc2(gelu(fc1(x)))); rows tiled over a 'parallel' grid."""
    m, dim = x.shape
    ffn = w1.shape[1]
    tile = _pick_row_tile(m)
    # TODO(synk): for very large FFN weights on v7x (64 MiB VMEM), single-buffer
    # the constant weight blocks (pipeline_mode=pl.Buffered(1)) or split the ffn
    # dim over a reduction grid axis.
    return pl.pallas_call(
        _ffn_block_kernel,
        out_shape=jax.ShapeDtypeStruct((m, dim), x.dtype),
        grid=(m // tile,),
        in_specs=[
            pl.BlockSpec((tile, dim), lambda i: (i, 0)),
            pl.BlockSpec((dim, ffn), lambda i: (0, 0)),
            pl.BlockSpec((1, ffn), lambda i: (0, 0)),
            pl.BlockSpec((ffn, dim), lambda i: (0, 0)),
            pl.BlockSpec((1, dim), lambda i: (0, 0)),
            pl.BlockSpec((1, dim), lambda i: (0, 0)),
            pl.BlockSpec((1, dim), lambda i: (0, 0)),
        ],
        out_specs=pl.BlockSpec((tile, dim), lambda i: (i, 0)),
        compiler_params=_compiler_params(1),
    )(x, w1, b1.reshape(1, ffn), w2, b2.reshape(1, dim),
      ln_g.reshape(1, dim), ln_b.reshape(1, dim))


def pallas_head(x, ln_g, ln_b, w, b):
    """Fused LN + classifier; classes padded to a multiple of 128 lanes."""
    m, dim = x.shape
    n = w.shape[1]
    n_pad = _round_up(n, LANE)
    wp = jnp.pad(w, ((0, 0), (0, n_pad - n))) if n_pad != n else w
    bp = jnp.pad(b, ((0, n_pad - n),)) if n_pad != n else b
    tile = _pick_row_tile(m)
    out = pl.pallas_call(
        _head_kernel,
        out_shape=jax.ShapeDtypeStruct((m, n_pad), jnp.float32),
        grid=(m // tile,),
        in_specs=[
            pl.BlockSpec((tile, dim), lambda i: (i, 0)),
            pl.BlockSpec((1, dim), lambda i: (0, 0)),
            pl.BlockSpec((1, dim), lambda i: (0, 0)),
            pl.BlockSpec((dim, n_pad), lambda i: (0, 0)),
            pl.BlockSpec((1, n_pad), lambda i: (0, 0)),
        ],
        out_specs=pl.BlockSpec((tile, n_pad), lambda i: (i, 0)),
        compiler_params=_compiler_params(1),
    )(x, ln_g.reshape(1, dim), ln_b.reshape(1, dim), wp, bp.reshape(1, n_pad))
    return out[:, :n]


# ------------------------- parameter setup -------------------------

def sinusoidal_embeddings(num_embeddings, dim):
    position = jnp.arange(num_embeddings, dtype=jnp.float32)[:, None]
    div_term = jnp.exp(
        jnp.arange(0, dim, 2, dtype=jnp.float32) * (-math.log(10000.0) / dim)
    )
    pe = jnp.zeros((num_embeddings, dim), dtype=jnp.float32)
    pe = pe.at[:, 0::2].set(jnp.sin(position * div_term))
    pe = pe.at[:, 1::2].set(jnp.cos(position * div_term))
    return pe[None]  # (1, num_embeddings, dim)


def init_params(key, *, image_size, patch_size, channels, dim, depth, heads,
                num_classes):
    num_patches = (image_size // patch_size) ** 2
    ffn_dim = 4 * dim
    scale = 0.02

    def nrm(k, shape):
        return scale * jax.random.normal(k, shape, dtype=jnp.float32)

    keys = jax.random.split(key, 4 + depth)
    params = {
        # conv weight (dim, C, p, p) flattened to (C*p*p, dim) for matmul
        "patch_w": nrm(keys[0], (channels * patch_size * patch_size, dim)),
        "patch_b": jnp.zeros((dim,), jnp.float32),
        "cls_token": jax.random.normal(keys[1], (1, 1, dim), dtype=jnp.float32),
        "pos_emb": sinusoidal_embeddings(num_patches + 1, dim),
        "head_ln_g": jnp.ones((dim,), jnp.float32),
        "head_ln_b": jnp.zeros((dim,), jnp.float32),
        "head_w": nrm(keys[2], (dim, num_classes)),
        "head_b": jnp.zeros((num_classes,), jnp.float32),
        "layers": [],
    }
    for l in range(depth):
        lk = jax.random.split(keys[4 + l], 4)
        params["layers"].append({
            "qkv_w": nrm(lk[0], (dim, 3 * dim)),
            "qkv_b": jnp.zeros((3 * dim,), jnp.float32),
            "proj_w": nrm(lk[1], (dim, dim)),
            "proj_b": jnp.zeros((dim,), jnp.float32),
            "ln1_g": jnp.ones((dim,), jnp.float32),
            "ln1_b": jnp.zeros((dim,), jnp.float32),
            "fc1_w": nrm(lk[2], (dim, ffn_dim)),
            "fc1_b": jnp.zeros((ffn_dim,), jnp.float32),
            "fc2_w": nrm(lk[3], (ffn_dim, dim)),
            "fc2_b": jnp.zeros((dim,), jnp.float32),
            "ln2_g": jnp.ones((dim,), jnp.float32),
            "ln2_b": jnp.zeros((dim,), jnp.float32),
        })
    return params


def prepare_inference_params(params, *, heads):
    """Fold attention scale into qkv weights; cast matmul weights to bf16."""
    dim = params["patch_w"].shape[1]
    head_dim = dim // heads
    scale = 1.0 / math.sqrt(head_dim)
    cdt = COMPUTE_DTYPE

    prep = {
        "patch_w": params["patch_w"].astype(cdt),
        "patch_b": params["patch_b"],
        "cls_token": params["cls_token"],
        "pos_emb": params["pos_emb"],
        "head_ln_g": params["head_ln_g"],
        "head_ln_b": params["head_ln_b"],
        "head_w": params["head_w"].astype(cdt),
        "head_b": params["head_b"],
        "layers": [],
    }
    qkv_scale = jnp.concatenate(
        [jnp.full((dim,), scale, jnp.float32), jnp.ones((2 * dim,), jnp.float32)])
    for layer in params["layers"]:
        prep["layers"].append({
            "qkv_w": (layer["qkv_w"] * qkv_scale[None, :]).astype(cdt),
            "qkv_b": layer["qkv_b"] * qkv_scale,
            "proj_w": layer["proj_w"].astype(cdt),
            "proj_b": layer["proj_b"],
            "ln1_g": layer["ln1_g"],
            "ln1_b": layer["ln1_b"],
            "fc1_w": layer["fc1_w"].astype(cdt),
            "fc1_b": layer["fc1_b"],
            "fc2_w": layer["fc2_w"].astype(cdt),
            "fc2_b": layer["fc2_b"],
            "ln2_g": layer["ln2_g"],
            "ln2_b": layer["ln2_b"],
        })
    return prep


# ------------------------- forward pass -------------------------

def vit_forward(params, img, *, patch_size, heads):
    """Inference forward. `params` must come from prepare_inference_params."""
    B, C, H, W = img.shape
    p = patch_size
    gh, gw = H // p, W // p
    n = gh * gw
    dim = params["patch_w"].shape[1]
    S = n + 1
    s_pad = _round_up(S, 8)

    # Patch embedding: Conv2d(kernel=stride=p) == per-patch linear projection.
    # Patch ordering matches flatten(2).transpose(1,2); per-patch features are
    # ordered (C, ph, pw) to match the conv weight layout.
    patches = (
        img.reshape(B, C, gh, p, gw, p)
        .transpose(0, 2, 4, 1, 3, 5)
        .reshape(B * n, C * p * p)
        .astype(COMPUTE_DTYPE)
    )
    x = pallas_linear(patches, params["patch_w"], params["patch_b"],
                      out_dtype=jnp.float32).reshape(B, n, dim)

    cls = jnp.broadcast_to(params["cls_token"], (B, 1, dim))
    x = jnp.concatenate([cls, x], axis=1) + params["pos_emb"][:, :S]
    # dropout -> identity (inference)
    # Pad the sequence ONCE to a multiple of 8 rows; padded rows are key-masked
    # inside the attention kernel (no per-layer pad/slice HBM copies).
    if s_pad != S:
        x = jnp.pad(x, ((0, 0), (0, s_pad - S), (0, 0)))
    x = x.astype(COMPUTE_DTYPE)                               # (B, s_pad, dim)

    for layer in params["layers"]:
        # fused: qkv proj + per-head attention + out-proj + residual + LayerNorm
        x = pallas_attention_block(
            x, layer["qkv_w"], layer["qkv_b"], layer["proj_w"], layer["proj_b"],
            layer["ln1_g"], layer["ln1_b"], heads=heads, s_valid=S)
        # fused: fc1 + GELU + fc2 + residual + LayerNorm (row-parallel)
        x = pallas_ffn_block(
            x.reshape(B * s_pad, dim),
            layer["fc1_w"], layer["fc1_b"], layer["fc2_w"], layer["fc2_b"],
            layer["ln2_g"], layer["ln2_b"]).reshape(B, s_pad, dim)

    # pool='cls' -> take the class token (row 0 is always a real row).
    cls_out = x[:, 0]                                         # (B, dim)
    logits = pallas_head(cls_out, params["head_ln_g"], params["head_ln_b"],
                         params["head_w"], params["head_b"])
    return logits                                             # (B, num_classes)


# ------------------------- main -------------------------

if __name__ == "__main__":
    # Small shapes consistent with the module's forward.
    IMAGE_SIZE = 16
    PATCH_SIZE = 8
    CHANNELS = 3
    DIM = 32
    DEPTH = 2
    HEADS = 4
    NUM_CLASSES = 10
    BATCH = 2

    key = jax.random.PRNGKey(0)
    pkey, xkey = jax.random.split(key)
    params = init_params(
        pkey,
        image_size=IMAGE_SIZE,
        patch_size=PATCH_SIZE,
        channels=CHANNELS,
        dim=DIM,
        depth=DEPTH,
        heads=HEADS,
        num_classes=NUM_CLASSES,
    )
    inf_params = prepare_inference_params(params, heads=HEADS)
    img = jax.random.normal(
        xkey, (BATCH, CHANNELS, IMAGE_SIZE, IMAGE_SIZE), dtype=jnp.float32
    )

    vit_fn = jax.jit(
        functools.partial(vit_forward, patch_size=PATCH_SIZE, heads=HEADS)
    )
    logits = vit_fn(inf_params, img)
    logits = jax.block_until_ready(logits)
    assert logits.shape == (BATCH, NUM_CLASSES)
    assert bool(jnp.all(jnp.isfinite(logits)))
    print("KERNEL_OK")
</pallas_src>

<mosaic_0001>
module attributes {stable_mosaic.version = 11 : i64} {
  func.func @_linear_kernel(%arg0: i32, %arg1: memref<8x192xbf16, #tpu.memory_space<vmem>>, %arg2: memref<192x32xbf16, #tpu.memory_space<vmem>>, %arg3: memref<1x32xf32, #tpu.memory_space<vmem>>, %arg4: memref<8x32xf32, #tpu.memory_space<vmem>>) attributes {dimension_semantics = [#tpu.dimension_semantics<parallel>], iteration_bounds = array<i64: 1>, scalar_prefetch = 0 : i64, scratch_operands = 0 : i64, tpu.core_type = #tpu.core_type<tc>, window_params = [{transform_indices = @transform_0, window_bounds = array<i64: 8, 192>}, {pipeline_mode = #tpu.pipeline_mode<synchronous>, transform_indices = @transform_1, window_bounds = array<i64: 192, 32>}, {pipeline_mode = #tpu.pipeline_mode<synchronous>, transform_indices = @transform_2, window_bounds = array<i64: 1, 32>}, {transform_indices = @transform_3, window_bounds = array<i64: 8, 32>}]} {
    %c0 = arith.constant 0 : index
    %c0_0 = arith.constant 0 : index
    %0 = vector.load %arg1[%c0, %c0_0] : memref<8x192xbf16, #tpu.memory_space<vmem>>, vector<8x192xbf16>
    %c0_1 = arith.constant 0 : index
    %c0_2 = arith.constant 0 : index
    %1 = vector.load %arg2[%c0_1, %c0_2] : memref<192x32xbf16, #tpu.memory_space<vmem>>, vector<192x32xbf16>
    %cst = arith.constant dense<0.000000e+00> : vector<8x32xf32>
    %2 = tpu.matmul %0, %1, %cst {dimension_numbers = #tpu.dot_dimension_numbers<[1], [0], [0], [1], [0, 0, 1, 1], [], []>} : vector<8x192xbf16>, vector<192x32xbf16>, vector<8x32xf32> -> vector<8x32xf32>
    %c0_3 = arith.constant 0 : index
    %c0_4 = arith.constant 0 : index
    %3 = vector.load %arg3[%c0_3, %c0_4] : memref<1x32xf32, #tpu.memory_space<vmem>>, vector<1x32xf32>
    %4 = vector.broadcast %3 : vector<1x32xf32> to vector<8x32xf32>
    %5 = arith.addf %2, %4 : vector<8x32xf32>
    %c0_5 = arith.constant 0 : index
    %c0_6 = arith.constant 0 : index
    %6 = vector.load %arg4[%c0_5, %c0_6] : memref<8x32xf32, #tpu.memory_space<vmem>>, vector<8x32xf32>
    tpu.vector_store %arg4[%c0_5, %c0_6], %5 {strides = array<i32>} : memref<8x32xf32, #tpu.memory_space<vmem>>, vector<8x32xf32>,
    return
  }
  func.func @transform_0(%arg0: i32) -> (i32, i32) {
    %c0_i32 = arith.constant 0 : i32
    %c0_i32_0 = arith.constant 0 : i32
    return %arg0, %c0_i32 : i32, i32
  }
  func.func @transform_1(%arg0: i32) -> (i32, i32) {
    %c0_i32 = arith.constant 0 : i32
    %c0_i32_0 = arith.constant 0 : i32
    %c0_i32_1 = arith.constant 0 : i32
    return %c0_i32, %c0_i32_0 : i32, i32
  }
  func.func @transform_2(%arg0: i32) -> (i32, i32) {
    %c0_i32 = arith.constant 0 : i32
    %c0_i32_0 = arith.constant 0 : i32
    %c0_i32_1 = arith.constant 0 : i32
    return %c0_i32, %c0_i32_0 : i32, i32
  }
  func.func @transform_3(%arg0: i32) -> (i32, i32) {
    %c0_i32 = arith.constant 0 : i32
    %c0_i32_0 = arith.constant 0 : i32
    return %arg0, %c0_i32 : i32, i32
  }
}

module attributes {stable_mosaic.version = 11 : i64} {
  func.func @_attn_block_kernel(%arg0: i32, %arg1: memref<1x8x32xbf16, #tpu.memory_space<vmem>>, %arg2: memref<32x96xbf16, #tpu.memory_space<vmem>>, %arg3: memref<1x96xf32, #tpu.memory_space<vmem>>, %arg4: memref<32x32xbf16, #tpu.memory_space<vmem>>, %arg5: memref<1x32xf32, #tpu.memory_space<vmem>>, %arg6: memref<1x32xf32, #tpu.memory_space<vmem>>, %arg7: memref<1x32xf32, #tpu.memory_space<vmem>>, %arg8: memref<1x8x32xbf16, #tpu.memory_space<vmem>>) attributes {dimension_semantics = [#tpu.dimension_semantics<parallel>], iteration_bounds = array<i64: 2>, scalar_prefetch = 0 : i64, scratch_operands = 0 : i64, tpu.core_type = #tpu.core_type<tc>, window_params = [{transform_indices = @transform_0, window_bounds = array<i64: 1, 8, 32>}, {pipeline_mode = #tpu.pipeline_mode<synchronous>, transform_indices = @transform_1, window_bounds = array<i64: 32, 96>}, {pipeline_mode = #tpu.pipeline_mode<synchronous>, transform_indices = @transform_2, window_bounds = array<i64: 1, 96>}, {pipeline_mode = #tpu.pipeline_mode<synchronous>, transform_indices = @transform_3, window_bounds = array<i64: 32, 32>}, {pipeline_mode = #tpu.pipeline_mode<synchronous>, transform_indices = @transform_4, window_bounds = array<i64: 1, 32>}, {pipeline_mode = #tpu.pipeline_mode<synchronous>, transform_indices = @transform_5, window_bounds = array<i64: 1, 32>}, {pipeline_mode = #tpu.pipeline_mode<synchronous>, transform_indices = @transform_6, window_bounds = array<i64: 1, 32>}, {transform_indices = @transform_7, window_bounds = array<i64: 1, 8, 32>}]} {
    %c0 = arith.constant 0 : index
    %c0_0 = arith.constant 0 : index
    %c0_1 = arith.constant 0 : index
    %0 = vector.load %arg1[%c0, %c0_0, %c0_1] : memref<1x8x32xbf16, #tpu.memory_space<vmem>>, vector<1x8x32xbf16>
    %1 = vector.shape_cast %0 : vector<1x8x32xbf16> to vector<8x32xbf16>
    %c0_2 = arith.constant 0 : index
    %c0_3 = arith.constant 0 : index
    %2 = vector.load %arg2[%c0_2, %c0_3] : memref<32x96xbf16, #tpu.memory_space<vmem>>, vector<32x96xbf16>
    %cst = arith.constant dense<0.000000e+00> : vector<8x96xf32>
    %3 = tpu.matmul %1, %2, %cst {dimension_numbers = #tpu.dot_dimension_numbers<[1], [0], [0], [1], [0, 0, 1, 1], [], []>} : vector<8x32xbf16>, vector<32x96xbf16>, vector<8x96xf32> -> vector<8x96xf32>
    %c0_4 = arith.constant 0 : index
    %c0_5 = arith.constant 0 : index
    %4 = vector.load %arg3[%c0_4, %c0_5] : memref<1x96xf32, #tpu.memory_space<vmem>>, vector<1x96xf32>
    %5 = vector.broadcast %4 : vector<1x96xf32> to vector<8x96xf32>
    %6 = arith.addf %3, %5 : vector<8x96xf32>
    %7 = arith.truncf %6 : vector<8x96xf32> to vector<8x96xbf16>
    %8 = vector.extract_strided_slice %7 {offsets = [0, 0], sizes = [8, 32], strides = [1, 1]} : vector<8x96xbf16> to vector<8x32xbf16>
    %9 = vector.extract_strided_slice %7 {offsets = [0, 32], sizes = [8, 32], strides = [1, 1]} : vector<8x96xbf16> to vector<8x32xbf16>
    %10 = vector.extract_strided_slice %7 {offsets = [0, 64], sizes = [8, 32], strides = [1, 1]} : vector<8x96xbf16> to vector<8x32xbf16>
    %11 = tpu.iota {dimensions = array<i32: 1>} : vector<8x8xi32>
    %c5_i32 = arith.constant 5 : i32
    %12 = vector.broadcast %c5_i32 : i32 to vector<8x8xi32>
    %13 = arith.cmpi slt, %11, %12 : vector<8x8xi32>
    %14 = vector.extract_strided_slice %8 {offsets = [0, 0], sizes = [8, 8], strides = [1, 1]} : vector<8x32xbf16> to vector<8x8xbf16>
    %15 = vector.extract_strided_slice %9 {offsets = [0, 0], sizes = [8, 8], strides = [1, 1]} : vector<8x32xbf16> to vector<8x8xbf16>
    %16 = vector.extract_strided_slice %10 {offsets = [0, 0], sizes = [8, 8], strides = [1, 1]} : vector<8x32xbf16> to vector<8x8xbf16>
    %cst_6 = arith.constant dense<0.000000e+00> : vector<8x8xf32>
    %17 = tpu.matmul %14, %15, %cst_6 {dimension_numbers = #tpu.dot_dimension_numbers<[1], [1], [0], [0], [0, 0, 1, 0], [], []>} : vector<8x8xbf16>, vector<8x8xbf16>, vector<8x8xf32> -> vector<8x8xf32>
    %cst_7 = arith.constant -1.000000e+30 : f32
    %18 = vector.broadcast %cst_7 : f32 to vector<8x8xf32>
    %19 = arith.select %13, %17, %18 : vector<8x8xi1>, vector<8x8xf32>
    %cst_8 = arith.constant dense<0xFF800000> : vector<8xf32>
    %20 = vector.multi_reduction <maximumf>, %19, %cst_8 [1] : vector<8x8xf32> to vector<8xf32>
    %21 = vector.shape_cast %20 : vector<8xf32> to vector<8x1xf32>
    %22 = vector.broadcast %21 : vector<8x1xf32> to vector<8x8xf32>
    %23 = arith.subf %19, %22 : vector<8x8xf32>
    %24 = math.exp %23 : vector<8x8xf32>
    %cst_9 = arith.constant dense<0.000000e+00> : vector<8xf32>
    %25 = vector.multi_reduction <add>, %24, %cst_9 [1] : vector<8x8xf32> to vector<8xf32>
    %26 = vector.shape_cast %25 : vector<8xf32> to vector<8x1xf32>
    %27 = tpu.reciprocal %26 {approx = true} : vector<8x1xf32> -> vector<8x1xf32>
    %28 = vector.broadcast %27 : vector<8x1xf32> to vector<8x8xf32>
    %29 = arith.mulf %24, %28 : vector<8x8xf32>
    %30 = arith.truncf %29 : vector<8x8xf32> to vector<8x8xbf16>
    %cst_10 = arith.constant dense<0.000000e+00> : vector<8x8xf32>
    %31 = tpu.matmul %30, %16, %cst_10 {dimension_numbers = #tpu.dot_dimension_numbers<[1], [0], [0], [1], [0, 0, 1, 1], [], []>} : vector<8x8xbf16>, vector<8x8xbf16>, vector<8x8xf32> -> vector<8x8xf32>
    %32 = arith.truncf %31 : vector<8x8xf32> to vector<8x8xbf16>
    %33 = vector.extract_strided_slice %8 {offsets = [0, 8], sizes = [8, 8], strides = [1, 1]} : vector<8x32xbf16> to vector<8x8xbf16>
    %34 = vector.extract_strided_slice %9 {offsets = [0, 8], sizes = [8, 8], strides = [1, 1]} : vector<8x32xbf16> to vector<8x8xbf16>
    %35 = vector.extract_strided_slice %10 {offsets = [0, 8], sizes = [8, 8], strides = [1, 1]} : vector<8x32xbf16> to vector<8x8xbf16>
    %cst_11 = arith.constant dense<0.000000e+00> : vector<8x8xf32>
    %36 = tpu.matmul %33, %34, %cst_11 {dimension_numbers = #tpu.dot_dimension_numbers<[1], [1], [0], [0], [0, 0, 1, 0], [], []>} : vector<8x8xbf16>, vector<8x8xbf16>, vector<8x8xf32> -> vector<8x8xf32>
    %cst_12 = arith.constant -1.000000e+30 : f32
    %37 = vector.broadcast %cst_12 : f32 to vector<8x8xf32>
    %38 = arith.select %13, %36, %37 : vector<8x8xi1>, vector<8x8xf32>
    %cst_13 = arith.constant dense<0xFF800000> : vector<8xf32>
    %39 = vector.multi_reduction <maximumf>, %38, %cst_13 [1] : vector<8x8xf32> to vector<8xf32>
    %40 = vector.shape_cast %39 : vector<8xf32> to vector<8x1xf32>
    %41 = vector.broadcast %40 : vector<8x1xf32> to vector<8x8xf32>
    %42 = arith.subf %38, %41 : vector<8x8xf32>
    %43 = math.exp %42 : vector<8x8xf32>
    %cst_14 = arith.constant dense<0.000000e+00> : vector<8xf32>
    %44 = vector.multi_reduction <add>, %43, %cst_14 [1] : vector<8x8xf32> to vector<8xf32>
    %45 = vector.shape_cast %44 : vector<8xf32> to vector<8x1xf32>
    %46 = tpu.reciprocal %45 {approx = true} : vector<8x1xf32> -> vector<8x1xf32>
    %47 = vector.broadcast %46 : vector<8x1xf32> to vector<8x8xf32>
    %48 = arith.mulf %43, %47 : vector<8x8xf32>
    %49 = arith.truncf %48 : vector<8x8xf32> to vector<8x8xbf16>
    %cst_15 = arith.constant dense<0.000000e+00> : vector<8x8xf32>
    %50 = tpu.matmul %49, %35, %cst_15 {dimension_numbers = #tpu.dot_dimension_numbers<[1], [0], [0], [1], [0, 0, 1, 1], [], []>} : vector<8x8xbf16>, vector<8x8xbf16>, vector<8x8xf32> -> vector<8x8xf32>
    %51 = arith.truncf %50 : vector<8x8xf32> to vector<8x8xbf16>
    %52 = vector.extract_strided_slice %8 {offsets = [0, 16], sizes = [8, 8], strides = [1, 1]} : vector<8x32xbf16> to vector<8x8xbf16>
    %53 = vector.extract_strided_slice %9 {offsets = [0, 16], sizes = [8, 8], strides = [1, 1]} : vector<8x32xbf16> to vector<8x8xbf16>
    %54 = vector.extract_strided_slice %10 {offsets = [0, 16], sizes = [8, 8], strides = [1, 1]} : vector<8x32xbf16> to vector<8x8xbf16>
    %cst_16 = arith.constant dense<0.000000e+00> : vector<8x8xf32>
    %55 = tpu.matmul %52, %53, %cst_16 {dimension_numbers = #tpu.dot_dimension_numbers<[1], [1], [0], [0], [0, 0, 1, 0], [], []>} : vector<8x8xbf16>, vector<8x8xbf16>, vector<8x8xf32> -> vector<8x8xf32>
    %cst_17 = arith.constant -1.000000e+30 : f32
    %56 = vector.broadcast %cst_17 : f32 to vector<8x8xf32>
    %57 = arith.select %13, %55, %56 : vector<8x8xi1>, vector<8x8xf32>
    %cst_18 = arith.constant dense<0xFF800000> : vector<8xf32>
    %58 = vector.multi_reduction <maximumf>, %57, %cst_18 [1] : vector<8x8xf32> to vector<8xf32>
    %59 = vector.shape_cast %58 : vector<8xf32> to vector<8x1xf32>
    %60 = vector.broadcast %59 : vector<8x1xf32> to vector<8x8xf32>
    %61 = arith.subf %57, %60 : vector<8x8xf32>
    %62 = math.exp %61 : vector<8x8xf32>
    %cst_19 = arith.constant dense<0.000000e+00> : vector<8xf32>
    %63 = vector.multi_reduction <add>, %62, %cst_19 [1] : vector<8x8xf32> to vector<8xf32>
    %64 = vector.shape_cast %63 : vector<8xf32> to vector<8x1xf32>
    %65 = tpu.reciprocal %64 {approx = true} : vector<8x1xf32> -> vector<8x1xf32>
    %66 = vector.broadcast %65 : vector<8x1xf32> to vector<8x8xf32>
    %67 = arith.mulf %62, %66 : vector<8x8xf32>
    %68 = arith.truncf %67 : vector<8x8xf32> to vector<8x8xbf16>
    %cst_20 = arith.constant dense<0.000000e+00> : vector<8x8xf32>
    %69 = tpu.matmul %68, %54, %cst_20 {dimension_numbers = #tpu.dot_dimension_numbers<[1], [0], [0], [1], [0, 0, 1, 1], [], []>} : vector<8x8xbf16>, vector<8x8xbf16>, vector<8x8xf32> -> vector<8x8xf32>
    %70 = arith.truncf %69 : vector<8x8xf32> to vector<8x8xbf16>
    %71 = vector.extract_strided_slice %8 {offsets = [0, 24], sizes = [8, 8], strides = [1, 1]} : vector<8x32xbf16> to vector<8x8xbf16>
    %72 = vector.extract_strided_slice %9 {offsets = [0, 24], sizes = [8, 8], strides = [1, 1]} : vector<8x32xbf16> to vector<8x8xbf16>
    %73 = vector.extract_strided_slice %10 {offsets = [0, 24], sizes = [8, 8], strides = [1, 1]} : vector<8x32xbf16> to vector<8x8xbf16>
    %cst_21 = arith.constant dense<0.000000e+00> : vector<8x8xf32>
    %74 = tpu.matmul %71, %72, %cst_21 {dimension_numbers = #tpu.dot_dimension_numbers<[1], [1], [0], [0], [0, 0, 1, 0], [], []>} : vector<8x8xbf16>, vector<8x8xbf16>, vector<8x8xf32> -> vector<8x8xf32>
    %cst_22 = arith.constant -1.000000e+30 : f32
    %75 = vector.broadcast %cst_22 : f32 to vector<8x8xf32>
    %76 = arith.select %13, %74, %75 : vector<8x8xi1>, vector<8x8xf32>
    %cst_23 = arith.constant dense<0xFF800000> : vector<8xf32>
    %77 = vector.multi_reduction <maximumf>, %76, %cst_23 [1] : vector<8x8xf32> to vector<8xf32>
    %78 = vector.shape_cast %77 : vector<8xf32> to vector<8x1xf32>
    %79 = vector.broadcast %78 : vector<8x1xf32> to vector<8x8xf32>
    %80 = arith.subf %76, %79 : vector<8x8xf32>
    %81 = math.exp %80 : vector<8x8xf32>
    %cst_24 = arith.constant dense<0.000000e+00> : vector<8xf32>
    %82 = vector.multi_reduction <add>, %81, %cst_24 [1] : vector<8x8xf32> to vector<8xf32>
    %83 = vector.shape_cast %82 : vector<8xf32> to vector<8x1xf32>
    %84 = tpu.reciprocal %83 {approx = true} : vector<8x1xf32> -> vector<8x1xf32>
    %85 = vector.broadcast %84 : vector<8x1xf32> to vector<8x8xf32>
    %86 = arith.mulf %81, %85 : vector<8x8xf32>
    %87 = arith.truncf %86 : vector<8x8xf32> to vector<8x8xbf16>
    %cst_25 = arith.constant dense<0.000000e+00> : vector<8x8xf32>
    %88 = tpu.matmul %87, %73, %cst_25 {dimension_numbers = #tpu.dot_dimension_numbers<[1], [0], [0], [1], [0, 0, 1, 1], [], []>} : vector<8x8xbf16>, vector<8x8xbf16>, vector<8x8xf32> -> vector<8x8xf32>
    %89 = arith.truncf %88 : vector<8x8xf32> to vector<8x8xbf16>
    %90 = tpu.concatenate %32, %51, %70, %89 in 1 : vector<8x8xbf16>, vector<8x8xbf16>, vector<8x8xbf16>, vector<8x8xbf16> -> vector<8x32xbf16>
    %c0_26 = arith.constant 0 : index
    %c0_27 = arith.constant 0 : index
    %91 = vector.load %arg4[%c0_26, %c0_27] : memref<32x32xbf16, #tpu.memory_space<vmem>>, vector<32x32xbf16>
    %cst_28 = arith.constant dense<0.000000e+00> : vector<8x32xf32>
    %92 = tpu.matmul %90, %91, %cst_28 {dimension_numbers = #tpu.dot_dimension_numbers<[1], [0], [0], [1], [0, 0, 1, 1], [], []>} : vector<8x32xbf16>, vector<32x32xbf16>, vector<8x32xf32> -> vector<8x32xf32>
    %c0_29 = arith.constant 0 : index
    %c0_30 = arith.constant 0 : index
    %93 = vector.load %arg5[%c0_29, %c0_30] : memref<1x32xf32, #tpu.memory_space<vmem>>, vector<1x32xf32>
    %94 = vector.broadcast %93 : vector<1x32xf32> to vector<8x32xf32>
    %95 = arith.addf %92, %94 : vector<8x32xf32>
    %96 = arith.extf %1 : vector<8x32xbf16> to vector<8x32xf32>
    %97 = arith.addf %95, %96 : vector<8x32xf32>
    %cst_31 = arith.constant dense<0.000000e+00> : vector<8xf32>
    %98 = vector.multi_reduction <add>, %97, %cst_31 [1] : vector<8x32xf32> to vector<8xf32>
    %99 = vector.shape_cast %98 : vector<8xf32> to vector<8x1xf32>
    %cst_32 = arith.constant 3.200000e+01 : f32
    %100 = vector.broadcast %cst_32 : f32 to vector<8x1xf32>
    %101 = arith.divf %99, %100 : vector<8x1xf32>
    %102 = vector.broadcast %101 : vector<8x1xf32> to vector<8x32xf32>
    %103 = arith.subf %97, %102 : vector<8x32xf32>
    %104 = arith.mulf %103, %103 : vector<8x32xf32>
    %cst_33 = arith.constant dense<0.000000e+00> : vector<8xf32>
    %105 = vector.multi_reduction <add>, %104, %cst_33 [1] : vector<8x32xf32> to vector<8xf32>
    %106 = vector.shape_cast %105 : vector<8xf32> to vector<8x1xf32>
    %cst_34 = arith.constant 3.200000e+01 : f32
    %107 = vector.broadcast %cst_34 : f32 to vector<8x1xf32>
    %108 = arith.divf %106, %107 : vector<8x1xf32>
    %cst_35 = arith.constant 9.99999974E-6 : f32
    %109 = vector.broadcast %cst_35 : f32 to vector<8x1xf32>
    %110 = arith.addf %108, %109 : vector<8x1xf32>
    %111 = math.rsqrt %110 : vector<8x1xf32>
    %112 = vector.broadcast %111 : vector<8x1xf32> to vector<8x32xf32>
    %113 = arith.mulf %103, %112 : vector<8x32xf32>
    %c0_36 = arith.constant 0 : index
    %c0_37 = arith.constant 0 : index
    %114 = vector.load %arg6[%c0_36, %c0_37] : memref<1x32xf32, #tpu.memory_space<vmem>>, vector<1x32xf32>
    %115 = vector.broadcast %114 : vector<1x32xf32> to vector<8x32xf32>
    %116 = arith.mulf %113, %115 : vector<8x32xf32>
    %c0_38 = arith.constant 0 : index
    %c0_39 = arith.constant 0 : index
    %117 = vector.load %arg7[%c0_38, %c0_39] : memref<1x32xf32, #tpu.memory_space<vmem>>, vector<1x32xf32>
    %118 = vector.broadcast %117 : vector<1x32xf32> to vector<8x32xf32>
    %119 = arith.addf %116, %118 : vector<8x32xf32>
    %120 = arith.truncf %119 : vector<8x32xf32> to vector<8x32xbf16>
    %c0_40 = arith.constant 0 : index
    %c0_41 = arith.constant 0 : index
    %c0_42 = arith.constant 0 : index
    %121 = vector.load %arg8[%c0_40, %c0_41, %c0_42] : memref<1x8x32xbf16, #tpu.memory_space<vmem>>, vector<1x8x32xbf16>
    %122 = vector.shape_cast %121 : vector<1x8x32xbf16> to vector<8x32xbf16>
    %123 = vector.shape_cast %120 : vector<8x32xbf16> to vector<1x8x32xbf16>
    tpu.vector_store %arg8[%c0_40, %c0_41, %c0_42], %123 {strides = array<i32>} : memref<1x8x32xbf16, #tpu.memory_space<vmem>>, vector<1x8x32xbf16>,
    return
  }
  func.func @transform_0(%arg0: i32) -> (i32, i32, i32) {
    %c0_i32 = arith.constant 0 : i32
    %c0_i32_0 = arith.constant 0 : i32
    %c0_i32_1 = arith.constant 0 : i32
    return %arg0, %c0_i32, %c0_i32_0 : i32, i32, i32
  }
  func.func @transform_1(%arg0: i32) -> (i32, i32) {
    %c0_i32 = arith.constant 0 : i32
    %c0_i32_0 = arith.constant 0 : i32
    %c0_i32_1 = arith.constant 0 : i32
    return %c0_i32, %c0_i32_0 : i32, i32
  }
  func.func @transform_2(%arg0: i32) -> (i32, i32) {
    %c0_i32 = arith.constant 0 : i32
    %c0_i32_0 = arith.constant 0 : i32
    %c0_i32_1 = arith.constant 0 : i32
    return %c0_i32, %c0_i32_0 : i32, i32
  }
  func.func @transform_3(%arg0: i32) -> (i32, i32) {
    %c0_i32 = arith.constant 0 : i32
    %c0_i32_0 = arith.constant 0 : i32
    %c0_i32_1 = arith.constant 0 : i32
    return %c0_i32, %c0_i32_0 : i32, i32
  }
  func.func @transform_4(%arg0: i32) -> (i32, i32) {
    %c0_i32 = arith.constant 0 : i32
    %c0_i32_0 = arith.constant 0 : i32
    %c0_i32_1 = arith.constant 0 : i32
    return %c0_i32, %c0_i32_0 : i32, i32
  }
  func.func @transform_5(%arg0: i32) -> (i32, i32) {
    %c0_i32 = arith.constant 0 : i32
    %c0_i32_0 = arith.constant 0 : i32
    %c0_i32_1 = arith.constant 0 : i32
    return %c0_i32, %c0_i32_0 : i32, i32
  }
  func.func @transform_6(%arg0: i32) -> (i32, i32) {
    %c0_i32 = arith.constant 0 : i32
    %c0_i32_0 = arith.constant 0 : i32
    %c0_i32_1 = arith.constant 0 : i32
    return %c0_i32, %c0_i32_0 : i32, i32
  }
  func.func @transform_7(%arg0: i32) -> (i32, i32, i32) {
    %c0_i32 = arith.constant 0 : i32
    %c0_i32_0 = arith.constant 0 : i32
    %c0_i32_1 = arith.constant 0 : i32
    return %arg0, %c0_i32, %c0_i32_0 : i32, i32, i32
  }
}

module attributes {stable_mosaic.version = 11 : i64} {
  func.func @_ffn_block_kernel(%arg0: i32, %arg1: memref<8x32xbf16, #tpu.memory_space<vmem>>, %arg2: memref<32x128xbf16, #tpu.memory_space<vmem>>, %arg3: memref<1x128xf32, #tpu.memory_space<vmem>>, %arg4: memref<128x32xbf16, #tpu.memory_space<vmem>>, %arg5: memref<1x32xf32, #tpu.memory_space<vmem>>, %arg6: memref<1x32xf32, #tpu.memory_space<vmem>>, %arg7: memref<1x32xf32, #tpu.memory_space<vmem>>, %arg8: memref<8x32xbf16, #tpu.memory_space<vmem>>) attributes {dimension_semantics = [#tpu.dimension_semantics<parallel>], iteration_bounds = array<i64: 2>, scalar_prefetch = 0 : i64, scratch_operands = 0 : i64, tpu.core_type = #tpu.core_type<tc>, window_params = [{transform_indices = @transform_0, window_bounds = array<i64: 8, 32>}, {pipeline_mode = #tpu.pipeline_mode<synchronous>, transform_indices = @transform_1, window_bounds = array<i64: 32, 128>}, {pipeline_mode = #tpu.pipeline_mode<synchronous>, transform_indices = @transform_2, window_bounds = array<i64: 1, 128>}, {pipeline_mode = #tpu.pipeline_mode<synchronous>, transform_indices = @transform_3, window_bounds = array<i64: 128, 32>}, {pipeline_mode = #tpu.pipeline_mode<synchronous>, transform_indices = @transform_4, window_bounds = array<i64: 1, 32>}, {pipeline_mode = #tpu.pipeline_mode<synchronous>, transform_indices = @transform_5, window_bounds = array<i64: 1, 32>}, {pipeline_mode = #tpu.pipeline_mode<synchronous>, transform_indices = @transform_6, window_bounds = array<i64: 1, 32>}, {transform_indices = @transform_7, window_bounds = array<i64: 8, 32>}]} {
    %c0 = arith.constant 0 : index
    %c0_0 = arith.constant 0 : index
    %0 = vector.load %arg1[%c0, %c0_0] : memref<8x32xbf16, #tpu.memory_space<vmem>>, vector<8x32xbf16>
    %c0_1 = arith.constant 0 : index
    %c0_2 = arith.constant 0 : index
    %1 = vector.load %arg2[%c0_1, %c0_2] : memref<32x128xbf16, #tpu.memory_space<vmem>>, vector<32x128xbf16>
    %cst = arith.constant dense<0.000000e+00> : vector<8x128xf32>
    %2 = tpu.matmul %0, %1, %cst {dimension_numbers = #tpu.dot_dimension_numbers<[1], [0], [0], [1], [0, 0, 1, 1], [], []>} : vector<8x32xbf16>, vector<32x128xbf16>, vector<8x128xf32> -> vector<8x128xf32>
    %c0_3 = arith.constant 0 : index
    %c0_4 = arith.constant 0 : index
    %3 = vector.load %arg3[%c0_3, %c0_4] : memref<1x128xf32, #tpu.memory_space<vmem>>, vector<1x128xf32>
    %4 = vector.broadcast %3 : vector<1x128xf32> to vector<8x128xf32>
    %5 = arith.addf %2, %4 : vector<8x128xf32>
    %6 = arith.mulf %5, %5 : vector<8x128xf32>
    %7 = arith.mulf %5, %6 : vector<8x128xf32>
    %cst_5 = arith.constant 4.471500e-02 : f32
    %8 = vector.broadcast %cst_5 : f32 to vector<8x128xf32>
    %9 = arith.mulf %8, %7 : vector<8x128xf32>
    %10 = arith.addf %5, %9 : vector<8x128xf32>
    %cst_6 = arith.constant 0.797884583 : f32
    %11 = vector.broadcast %cst_6 : f32 to vector<8x128xf32>
    %12 = arith.mulf %11, %10 : vector<8x128xf32>
    %13 = math.tanh %12 : vector<8x128xf32>
    %cst_7 = arith.constant 1.000000e+00 : f32
    %14 = vector.broadcast %cst_7 : f32 to vector<8x128xf32>
    %15 = arith.addf %14, %13 : vector<8x128xf32>
    %cst_8 = arith.constant 5.000000e-01 : f32
    %16 = vector.broadcast %cst_8 : f32 to vector<8x128xf32>
    %17 = arith.mulf %16, %15 : vector<8x128xf32>
    %18 = arith.mulf %5, %17 : vector<8x128xf32>
    %19 = arith.truncf %18 : vector<8x128xf32> to vector<8x128xbf16>
    %c0_9 = arith.constant 0 : index
    %c0_10 = arith.constant 0 : index
    %20 = vector.load %arg4[%c0_9, %c0_10] : memref<128x32xbf16, #tpu.memory_space<vmem>>, vector<128x32xbf16>
    %cst_11 = arith.constant dense<0.000000e+00> : vector<8x32xf32>
    %21 = tpu.matmul %19, %20, %cst_11 {dimension_numbers = #tpu.dot_dimension_numbers<[1], [0], [0], [1], [0, 0, 1, 1], [], []>} : vector<8x128xbf16>, vector<128x32xbf16>, vector<8x32xf32> -> vector<8x32xf32>
    %c0_12 = arith.constant 0 : index
    %c0_13 = arith.constant 0 : index
    %22 = vector.load %arg5[%c0_12, %c0_13] : memref<1x32xf32, #tpu.memory_space<vmem>>, vector<1x32xf32>
    %23 = vector.broadcast %22 : vector<1x32xf32> to vector<8x32xf32>
    %24 = arith.addf %21, %23 : vector<8x32xf32>
    %25 = arith.extf %0 : vector<8x32xbf16> to vector<8x32xf32>
    %26 = arith.addf %24, %25 : vector<8x32xf32>
    %cst_14 = arith.constant dense<0.000000e+00> : vector<8xf32>
    %27 = vector.multi_reduction <add>, %26, %cst_14 [1] : vector<8x32xf32> to vector<8xf32>
    %28 = vector.shape_cast %27 : vector<8xf32> to vector<8x1xf32>
    %cst_15 = arith.constant 3.200000e+01 : f32
    %29 = vector.broadcast %cst_15 : f32 to vector<8x1xf32>
    %30 = arith.divf %28, %29 : vector<8x1xf32>
    %31 = vector.broadcast %30 : vector<8x1xf32> to vector<8x32xf32>
    %32 = arith.subf %26, %31 : vector<8x32xf32>
    %33 = arith.mulf %32, %32 : vector<8x32xf32>
    %cst_16 = arith.constant dense<0.000000e+00> : vector<8xf32>
    %34 = vector.multi_reduction <add>, %33, %cst_16 [1] : vector<8x32xf32> to vector<8xf32>
    %35 = vector.shape_cast %34 : vector<8xf32> to vector<8x1xf32>
    %cst_17 = arith.constant 3.200000e+01 : f32
    %36 = vector.broadcast %cst_17 : f32 to vector<8x1xf32>
    %37 = arith.divf %35, %36 : vector<8x1xf32>
    %cst_18 = arith.constant 9.99999974E-6 : f32
    %38 = vector.broadcast %cst_18 : f32 to vector<8x1xf32>
    %39 = arith.addf %37, %38 : vector<8x1xf32>
    %40 = math.rsqrt %39 : vector<8x1xf32>
    %41 = vector.broadcast %40 : vector<8x1xf32> to vector<8x32xf32>
    %42 = arith.mulf %32, %41 : vector<8x32xf32>
    %c0_19 = arith.constant 0 : index
    %c0_20 = arith.constant 0 : index
    %43 = vector.load %arg6[%c0_19, %c0_20] : memref<1x32xf32, #tpu.memory_space<vmem>>, vector<1x32xf32>
    %44 = vector.broadcast %43 : vector<1x32xf32> to vector<8x32xf32>
    %45 = arith.mulf %42, %44 : vector<8x32xf32>
    %c0_21 = arith.constant 0 : index
    %c0_22 = arith.constant 0 : index
    %46 = vector.load %arg7[%c0_21, %c0_22] : memref<1x32xf32, #tpu.memory_space<vmem>>, vector<1x32xf32>
    %47 = vector.broadcast %46 : vector<1x32xf32> to vector<8x32xf32>
    %48 = arith.addf %45, %47 : vector<8x32xf32>
    %49 = arith.truncf %48 : vector<8x32xf32> to vector<8x32xbf16>
    %c0_23 = arith.constant 0 : index
    %c0_24 = arith.constant 0 : index
    %50 = vector.load %arg8[%c0_23, %c0_24] : memref<8x32xbf16, #tpu.memory_space<vmem>>, vector<8x32xbf16>
    tpu.vector_store %arg8[%c0_23, %c0_24], %49 {strides = array<i32>} : memref<8x32xbf16, #tpu.memory_space<vmem>>, vector<8x32xbf16>,
    return
  }
  func.func @transform_0(%arg0: i32) -> (i32, i32) {
    %c0_i32 = arith.constant 0 : i32
    %c0_i32_0 = arith.constant 0 : i32
    return %arg0, %c0_i32 : i32, i32
  }
  func.func @transform_1(%arg0: i32) -> (i32, i32) {
    %c0_i32 = arith.constant 0 : i32
    %c0_i32_0 = arith.constant 0 : i32
    %c0_i32_1 = arith.constant 0 : i32
    return %c0_i32, %c0_i32_0 : i32, i32
  }
  func.func @transform_2(%arg0: i32) -> (i32, i32) {
    %c0_i32 = arith.constant 0 : i32
    %c0_i32_0 = arith.constant 0 : i32
    %c0_i32_1 = arith.constant 0 : i32
    return %c0_i32, %c0_i32_0 : i32, i32
  }
  func.func @transform_3(%arg0: i32) -> (i32, i32) {
    %c0_i32 = arith.constant 0 : i32
    %c0_i32_0 = arith.constant 0 : i32
    %c0_i32_1 = arith.constant 0 : i32
    return %c0_i32, %c0_i32_0 : i32, i32
  }
  func.func @transform_4(%arg0: i32) -> (i32, i32) {
    %c0_i32 = arith.constant 0 : i32
    %c0_i32_0 = arith.constant 0 : i32
    %c0_i32_1 = arith.constant 0 : i32
    return %c0_i32, %c0_i32_0 : i32, i32
  }
  func.func @transform_5(%arg0: i32) -> (i32, i32) {
    %c0_i32 = arith.constant 0 : i32
    %c0_i32_0 = arith.constant 0 : i32
    %c0_i32_1 = arith.constant 0 : i32
    return %c0_i32, %c0_i32_0 : i32, i32
  }
  func.func @transform_6(%arg0: i32) -> (i32, i32) {
    %c0_i32 = arith.constant 0 : i32
    %c0_i32_0 = arith.constant 0 : i32
    %c0_i32_1 = arith.constant 0 : i32
    return %c0_i32, %c0_i32_0 : i32, i32
  }
  func.func @transform_7(%arg0: i32) -> (i32, i32) {
    %c0_i32 = arith.constant 0 : i32
    %c0_i32_0 = arith.constant 0 : i32
    return %arg0, %c0_i32 : i32, i32
  }
}

module attributes {stable_mosaic.version = 11 : i64} {
  func.func @_head_kernel(%arg0: i32, %arg1: memref<2x32xbf16, #tpu.memory_space<vmem>>, %arg2: memref<1x32xf32, #tpu.memory_space<vmem>>, %arg3: memref<1x32xf32, #tpu.memory_space<vmem>>, %arg4: memref<32x128xbf16, #tpu.memory_space<vmem>>, %arg5: memref<1x128xf32, #tpu.memory_space<vmem>>, %arg6: memref<2x128xf32, #tpu.memory_space<vmem>>) attributes {dimension_semantics = [#tpu.dimension_semantics<parallel>], iteration_bounds = array<i64: 1>, scalar_prefetch = 0 : i64, scratch_operands = 0 : i64, tpu.core_type = #tpu.core_type<tc>, window_params = [{transform_indices = @transform_0, window_bounds = array<i64: 2, 32>}, {pipeline_mode = #tpu.pipeline_mode<synchronous>, transform_indices = @transform_1, window_bounds = array<i64: 1, 32>}, {pipeline_mode = #tpu.pipeline_mode<synchronous>, transform_indices = @transform_2, window_bounds = array<i64: 1, 32>}, {pipeline_mode = #tpu.pipeline_mode<synchronous>, transform_indices = @transform_3, window_bounds = array<i64: 32, 128>}, {pipeline_mode = #tpu.pipeline_mode<synchronous>, transform_indices = @transform_4, window_bounds = array<i64: 1, 128>}, {transform_indices = @transform_5, window_bounds = array<i64: 2, 128>}]} {
    %c0 = arith.constant 0 : index
    %c0_0 = arith.constant 0 : index
    %0 = vector.load %arg1[%c0, %c0_0] : memref<2x32xbf16, #tpu.memory_space<vmem>>, vector<2x32xbf16>
    %1 = arith.extf %0 : vector<2x32xbf16> to vector<2x32xf32>
    %cst = arith.constant dense<0.000000e+00> : vector<2xf32>
    %2 = vector.multi_reduction <add>, %1, %cst [1] : vector<2x32xf32> to vector<2xf32>
    %3 = vector.shape_cast %2 : vector<2xf32> to vector<2x1xf32>
    %cst_1 = arith.constant 3.200000e+01 : f32
    %4 = vector.broadcast %cst_1 : f32 to vector<2x1xf32>
    %5 = arith.divf %3, %4 : vector<2x1xf32>
    %6 = vector.broadcast %5 : vector<2x1xf32> to vector<2x32xf32>
    %7 = arith.subf %1, %6 : vector<2x32xf32>
    %8 = arith.mulf %7, %7 : vector<2x32xf32>
    %cst_2 = arith.constant dense<0.000000e+00> : vector<2xf32>
    %9 = vector.multi_reduction <add>, %8, %cst_2 [1] : vector<2x32xf32> to vector<2xf32>
    %10 = vector.shape_cast %9 : vector<2xf32> to vector<2x1xf32>
    %cst_3 = arith.constant 3.200000e+01 : f32
    %11 = vector.broadcast %cst_3 : f32 to vector<2x1xf32>
    %12 = arith.divf %10, %11 : vector<2x1xf32>
    %cst_4 = arith.constant 9.99999974E-6 : f32
    %13 = vector.broadcast %cst_4 : f32 to vector<2x1xf32>
    %14 = arith.addf %12, %13 : vector<2x1xf32>
    %15 = math.rsqrt %14 : vector<2x1xf32>
    %16 = vector.broadcast %15 : vector<2x1xf32> to vector<2x32xf32>
    %17 = arith.mulf %7, %16 : vector<2x32xf32>
    %c0_5 = arith.constant 0 : index
    %c0_6 = arith.constant 0 : index
    %18 = vector.load %arg2[%c0_5, %c0_6] : memref<1x32xf32, #tpu.memory_space<vmem>>, vector<1x32xf32>
    %19 = vector.broadcast %18 : vector<1x32xf32> to vector<2x32xf32>
    %20 = arith.mulf %17, %19 : vector<2x32xf32>
    %c0_7 = arith.constant 0 : index
    %c0_8 = arith.constant 0 : index
    %21 = vector.load %arg3[%c0_7, %c0_8] : memref<1x32xf32, #tpu.memory_space<vmem>>, vector<1x32xf32>
    %22 = vector.broadcast %21 : vector<1x32xf32> to vector<2x32xf32>
    %23 = arith.addf %20, %22 : vector<2x32xf32>
    %24 = arith.truncf %23 : vector<2x32xf32> to vector<2x32xbf16>
    %c0_9 = arith.constant 0 : index
    %c0_10 = arith.constant 0 : index
    %25 = vector.load %arg4[%c0_9, %c0_10] : memref<32x128xbf16, #tpu.memory_space<vmem>>, vector<32x128xbf16>
    %cst_11 = arith.constant dense<0.000000e+00> : vector<2x128xf32>
    %26 = tpu.matmul %24, %25, %cst_11 {dimension_numbers = #tpu.dot_dimension_numbers<[1], [0], [0], [1], [0, 0, 1, 1], [], []>} : vector<2x32xbf16>, vector<32x128xbf16>, vector<2x128xf32> -> vector<2x128xf32>
    %c0_12 = arith.constant 0 : index
    %c0_13 = arith.constant 0 : index
    %27 = vector.load %arg5[%c0_12, %c0_13] : memref<1x128xf32, #tpu.memory_space<vmem>>, vector<1x128xf32>
    %28 = vector.broadcast %27 : vector<1x128xf32> to vector<2x128xf32>
    %29 = arith.addf %26, %28 : vector<2x128xf32>
    %c0_14 = arith.constant 0 : index
    %c0_15 = arith.constant 0 : index
    %30 = vector.load %arg6[%c0_14, %c0_15] : memref<2x128xf32, #tpu.memory_space<vmem>>, vector<2x128xf32>
    tpu.vector_store %arg6[%c0_14, %c0_15], %29 {strides = array<i32>} : memref<2x128xf32, #tpu.memory_space<vmem>>, vector<2x128xf32>,
    return
  }
  func.func @transform_0(%arg0: i32) -> (i32, i32) {
    %c0_i32 = arith.constant 0 : i32
    %c0_i32_0 = arith.constant 0 : i32
    return %arg0, %c0_i32 : i32, i32
  }
  func.func @transform_1(%arg0: i32) -> (i32, i32) {
    %c0_i32 = arith.constant 0 : i32
    %c0_i32_0 = arith.constant 0 : i32
    %c0_i32_1 = arith.constant 0 : i32
    return %c0_i32, %c0_i32_0 : i32, i32
  }
  func.func @transform_2(%arg0: i32) -> (i32, i32) {
    %c0_i32 = arith.constant 0 : i32
    %c0_i32_0 = arith.constant 0 : i32
    %c0_i32_1 = arith.constant 0 : i32
    return %c0_i32, %c0_i32_0 : i32, i32
  }
  func.func @transform_3(%arg0: i32) -> (i32, i32) {
    %c0_i32 = arith.constant 0 : i32
    %c0_i32_0 = arith.constant 0 : i32
    %c0_i32_1 = arith.constant 0 : i32
    return %c0_i32, %c0_i32_0 : i32, i32
  }
  func.func @transform_4(%arg0: i32) -> (i32, i32) {
    %c0_i32 = arith.constant 0 : i32
    %c0_i32_0 = arith.constant 0 : i32
    %c0_i32_1 = arith.constant 0 : i32
    return %c0_i32, %c0_i32_0 : i32, i32
  }
  func.func @transform_5(%arg0: i32) -> (i32, i32) {
    %c0_i32 = arith.constant 0 : i32
    %c0_i32_0 = arith.constant 0 : i32
    return %arg0, %c0_i32 : i32, i32
  }
}

</mosaic_0001>

<bundles_post_ra>
// kernel: vit_forward.6
= control target key start
LH: loop header
LB: loop body
LE: loop exit
PB: predicated region body
PF: predicated region fallthrough
CT: control target
= control target key end

     0   :  { %v206_v0 = vmov 0   ;;  %vm125_vm0 = vcmask 523264   ;;  %vm169_vm1 = vcmask 261120   ;;  %s272_s1 = inlined_call_operand.vmem [shape: bf16[192,32], index: 1, kind: input, shape index: {}]   ;;  %s273_s0 = inlined_call_operand.vmem [shape: bf16[8,192], index: 0, kind: input, shape index: {}]   ;;  %s274_s2 = inlined_call_operand.vmem [shape: f32[1,32], index: 2, kind: input, shape index: {}]   ;;  %s275_s3 = inlined_call_operand.vmem [shape: f32[8,32], index: 3, kind: output, shape index: {}]  }
   0x1   :  { %129 = vmatprep.subr.bf16.mxu0 %v206_v0  ;;  %v192_v1 = vld [vmem:[%s272_s1] sm:$0xff]   ;;  %v193_v2 = vld [vmem:[%s272_s1 + $0x8] sm:$0xff]   ;;  %v194_v3 = vld [vmem:[%s272_s1 + $0x10] sm:$0xff]  }
   0x2   :  { %130 = vmatpush1.bf16.msra.mxu0 %v192_v1  ;;  %v195_v4 = vld [vmem:[%s272_s1 + $0x18] sm:$0xff]   ;;  %v15_v5 = vld [vmem:[%s273_s0] sm:$0xff]  ;;  %v197_v8 = vld [vmem:[%s272_s1 + $0x28] sm:$0xff]  }
   0x3   :  { %131 = vmatprep.subr.bf16.mxu0 %v206_v0  ;;  %v177_v6 = vcombine.high %v15_v5, %v15_v5  ;;  %v196_v7 = vld [vmem:[%s272_s1 + $0x20] sm:$0xff]   ;;  %v198_v9 = vld [vmem:[%s272_s1 + $0x30] sm:$0xff]   ;;  %v199_v10 = vld [vmem:[%s272_s1 + $0x38] sm:$0xff]   ;;  %v176_v15 = vcombine.low %v15_v5, %v15_v5 }
   0x4   :  { %v200_v11 = vld [vmem:[%s272_s1 + $0x40] sm:$0xff]   ;;  %v201_v12 = vld [vmem:[%s272_s1 + $0x48] sm:$0xff]   ;;  %v202_v13 = vld [vmem:[%s272_s1 + $0x50] sm:$0xff]  }
   0x5   :  { %190 = vmatprep.mubr.msk.bf16.mxu0 %vm125_vm0, %v177_v6  ;;  %v203_v14 = vld [vmem:[%s272_s1 + $0x58] sm:$0xff]   ;;  %v175_v16 = vld [vmem:[%s274_s2] ss:$0 sm:$0xff] }
   0x6   :  { %132 = vmatpush1.bf16.msra.mxu0 %v193_v2 }
   0x7   :  { %133 = vmatprep.subr.bf16.mxu0 %v206_v0 }
   0xa   :  { %134 = vmatpush1.bf16.msra.mxu0 %v194_v3 }
   0xb   :  { %135 = vmatprep.subr.bf16.mxu0 %v206_v0 }
   0xe   :  { %136 = vmatpush1.bf16.msra.mxu0 %v195_v4 }
   0xf   :  { %137 = vmatprep.subr.bf16.mxu0 %v206_v0 }
  0x12   :  { %138 = vmatpush1.bf16.msra.mxu0 %v196_v7 }
  0x13   :  { %139 = vmatprep.subr.bf16.mxu0 %v206_v0 }
  0x16   :  { %140 = vmatpush1.bf16.msra.mxu0 %v197_v8 }
  0x17   :  { %141 = vmatprep.subr.bf16.mxu0 %v206_v0 }
  0x1a   :  { %142 = vmatpush1.bf16.msra.mxu0 %v198_v9 }
  0x1b   :  { %143 = vmatprep.subr.bf16.mxu0 %v206_v0 }
  0x1e   :  { %144 = vmatpush1.bf16.msra.mxu0 %v199_v10 }
  0x1f   :  { %145 = vmatprep.subr.bf16.mxu0 %v206_v0 }
  0x22   :  { %146 = vmatpush1.bf16.msra.mxu0 %v200_v11 }
  0x23   :  { %147 = vmatprep.subr.bf16.mxu0 %v206_v0 }
  0x26   :  { %148 = vmatpush1.bf16.msra.mxu0 %v201_v12 }
  0x27   :  { %149 = vmatprep.subr.bf16.mxu0 %v206_v0 }
  0x2a   :  { %150 = vmatpush1.bf16.msra.mxu0 %v202_v13 }
  0x2b   :  { %151 = vmatprep.subr.bf16.mxu0 %v206_v0 }
  0x2e   :  { %152 = vmatpush1.bf16.msra.mxu0 %v203_v14 }
  0x31   :  { %162 = vmatmul.mubr.bf16.vlgmr.msra.gmra.mrb[0].mxu0 %v176_v15 }
 0x104   :  { %v163_v17 = vpop.f32.mrb[0].mxu0 }
 0x105   :  { %v164_v18 = vadd.f32 %v175_v16, %v163_v17  ;;  %v165_v19 = vpop.f32.mrb[1].mxu0 }
 0x106   :  { %v166_v20 = vpop.f32.mrb[2].mxu0 }
 0x107   :  { %170 = vst.msk [vmem:[%s275_s3] sm:$0xff] %vm169_vm1, %v164_v18  ;;  %v167_v21 = vpop.f32.mrb[3].mxu0 }

// kernel: vit_forward.8
= control target key start
LH: loop header
LB: loop body
LE: loop exit
PB: predicated region body
PF: predicated region fallthrough
CT: control target
= control target key end

     0   :  { %s690_s24 = smov 0   ;;  %s759_s0 = inlined_call_operand.vmem [shape: bf16[16,32], index: 0, kind: input, shape index: {}]   ;;  %s760_s1 = inlined_call_operand.vmem [shape: bf16[32,128], index: 1, kind: input, shape index: {}]   ;;  %s761_s2 = inlined_call_operand.vmem [shape: f32[1,128], index: 2, kind: input, shape index: {}]   ;;  %s762_s3 = inlined_call_operand.vmem [shape: bf16[128,32], index: 3, kind: input, shape index: {}]   ;;  %s763_s4 = inlined_call_operand.vmem [shape: f32[1,32], index: 4, kind: input, shape index: {}]   ;;  %s764_s5 = inlined_call_operand.vmem [shape: f32[1,32], index: 5, kind: input, shape index: {}]   ;;  %s765_s6 = inlined_call_operand.vmem [shape: f32[1,32], index: 6, kind: input, shape index: {}]   ;;  %s766_s7 = inlined_call_operand.vmem [shape: bf16[16,32], index: 7, kind: output, shape index: {}]  }
   0x1 LB: > { %s552_s25 = sadd.s32 4294967295, %s646_s24   ;;  %p556_p0 = scmp.ge.s32.totalorder %s646_s24, 1  ;;  %s646_s24 = sphi %s690_s24, %s17_s24  }
   0x2   : > { %p236_p1 = scmp.lt.s32.totalorder %s646_s24, 3 }
   0x4   : > { %p237_p2 = pnand %p556_p0, %p236_p1 }
   0x5   : > { %v626_v0 = vld [vmem:[%s760_s1] sm:$0xff] (!%p237_p2)   ;;  %v648_v1 = vmov (!%p237_p2), 0.0   ;;  %v627_v2 = vld [vmem:[%s760_s1 + $0x8] sm:$0xff] (!%p237_p2)   ;;  %vm649_vm0 = vmmov (!%p237_p2), 0   ;;  %p266_p3 = scmp.lt.s32.totalorder (!%p237_p2), %s552_s25, 1  ;;  %vm299_vm1 = vcmask (!%p237_p2), 261120  }
   0x6   : > { %240 = sbr.rel (%p237_p2) target bundleno = 792 (0x318), region = 48  ;;  %588 = vmatprep.subr.bf16.mxu0 (!%p237_p2), %v648_v1  ;;  %596 = vmatprep.subr.bf16.mxu1 (!%p237_p2), %v648_v1  ;;  %v628_v4 = vld [vmem:[%s762_s3] sm:$0xff] (!%p237_p2)   ;;  %v629_v5 = vld [vmem:[%s762_s3 + $0x8] sm:$0xff] (!%p237_p2)   ;;  %v630_v6 = vld [vmem:[%s762_s3 + $0x10] sm:$0xff] (!%p237_p2)   ;;  %vm497_vm2 = vcmask (!%p237_p2), 257024  }
   0x7   : > { %589 = vmatpush3.bf16.msra.mxu0 (!%p237_p2), %v626_v0  ;;  %592 = vmatprep.mubr.msk.bf16.mxu0 (!%p237_p2), %vm649_vm0, %v648_v1  ;;  %v631_v7 = vld [vmem:[%s762_s3 + $0x18] sm:$0xff] (!%p237_p2)   ;;  %v632_v8 = vld [vmem:[%s762_s3 + $0x20] sm:$0xff] (!%p237_p2)   ;;  %v633_v9 = vld [vmem:[%s762_s3 + $0x28] sm:$0xff] (!%p237_p2)  }
   0x8   : > { %590 = vmatprep.subr.bf16.mxu0 (!%p237_p2), %v648_v1  ;;  %612 = vmatprep.mubr.msk.bf16.mxu1 (!%p237_p2), %vm649_vm0, %v648_v1  ;;  %v634_v10 = vld [vmem:[%s762_s3 + $0x30] sm:$0xff] (!%p237_p2)   ;;  %v635_v11 = vld [vmem:[%s762_s3 + $0x38] sm:$0xff] (!%p237_p2)   ;;  %v559_v12 = vld [vmem:[%s761_s2] ss:$0 sm:$0xff] (!%p237_p2) }
   0x9   : > { %597 = vmatpush3.bf16.msra.mxu1 (!%p237_p2), %v628_v4  ;;  %v563_v28 = vld [vmem:[%s763_s4] ss:$0 sm:$0xff] (!%p237_p2) }
   0xa   : > { %598 = vmatprep.subr.bf16.mxu1 (!%p237_p2), %v648_v1  ;;  %v572_v46 = vld [vmem:[%s764_s5] ss:$0 sm:$0xff] (!%p237_p2) }
   0xb   : > { %591 = vmatpush3.bf16.msra.mxu0 (!%p237_p2), %v627_v2  ;;  %v573_v48 = vld [vmem:[%s765_s6] ss:$0 sm:$0xff] (!%p237_p2) }
   0xd   : > { %s768_s25 = smov (!%p266_p3, %s552_s25), 1  ;;  %599 = vmatpush3.bf16.msra.mxu1 %v629_v5 }
   0xe   : > { %s557_s30 = sshll.u32 %s768_s25, 2  ;;  %600 = vmatprep.subr.bf16.mxu1 %v648_v1 }
   0xf   : > { %s269_s10 = scalar_lea.vmem %s759_s0, %s557_s30  ;;  %s273_s17 = scalar_lea.vmem %s766_s7, %s557_s30 }
  0x10   : > { %v275_v3 = vld [vmem:[%s269_s10] sm:$0xf] }
  0x11   : > { %593 = vmatmul.mubr.msk.bf16.vlgmr.msra.gmra.mrb[0].mxu0 %vm299_vm1, %v275_v3  ;;  %601 = vmatpush3.bf16.msra.mxu1 %v630_v6  ;;  %v464_v29 = vunpack.c.l.bf16 %v275_v3 }
  0x12   : > { %602 = vmatprep.subr.bf16.mxu1 %v648_v1 }
  0x15   : > { %603 = vmatpush3.bf16.msra.mxu1 %v631_v7 }
  0x16   : > { %604 = vmatprep.subr.bf16.mxu1 %v648_v1 }
  0x19   : > { %605 = vmatpush3.bf16.msra.mxu1 %v632_v8 }
  0x1a   : > { %606 = vmatprep.subr.bf16.mxu1 %v648_v1 }
  0x1d   : > { %607 = vmatpush3.bf16.msra.mxu1 %v633_v9 }
  0x1e   : > { %608 = vmatprep.subr.bf16.mxu1 %v648_v1 }
  0x21   : > { %609 = vmatpush3.bf16.msra.mxu1 %v634_v10 }
  0x22   : > { %610 = vmatprep.subr.bf16.mxu1 %v648_v1 }
  0x25   : > { %611 = vmatpush3.bf16.msra.mxu1 %v635_v11 }
  0xe4   : > { %v337_v13 = vpop.f32.mrb[0].mxu0 }
  0xe5   : > { %v338_v14 = vadd.f32 %v559_v12, %v337_v13  ;;  %v594_v15 = vpop.f32.mrb[1].mxu0 }
  0xe6   : > { %v340_v16 = vpop.f32.mrb[2].mxu0 }
  0xe7   : > { %v343_v17 = vmul.f32 %v338_v14, %v338_v14  ;;  %v595_v18 = vpop.f32.mrb[3].mxu0 }
  0xe9   : > { %v344_v19 = vmul.f32 %v343_v17, %v338_v14 }
  0xeb   : > { %v345_v20 = vmul.f32 0.044715, %v344_v19 }
  0xed   : > { %v346_v21 = vadd.f32 %v345_v20, %v338_v14 }
  0xef   : > { %v347_v22 = vmul.f32 0.7978846, %v346_v21 }
  0xf1   : > { %636 = vtanh.f32 %v347_v22 }
  0xfb   : > { %v637_v23 = vpop.eup %636 }
  0xfc   : > { %v349_v24 = vadd.f32 1.0, %v637_v23 }
  0xfe   : > { %v350_v25 = vmul.f32 0.5, %v349_v24 }
 0x100   : > { %v351_v26 = vmul.f32 %v350_v25, %v338_v14 }
 0x102   : > { %v352_v27 = vpack.c.bf16 %v351_v26, %v351_v26 }
 0x104   : > { %613 = vmatmul.mubr.bf16.vlgmr.msra.gmra.mrb[0].mxu1 %v352_v27 }
 0x1d7   : > { %v458_v30 = vpop.f32.mrb[0].mxu1 }
 0x1d8   : > { %v459_v31 = vadd.f32 %v563_v28, %v458_v30  ;;  %v614_v32 = vpop.f32.mrb[1].mxu1 }
 0x1d9   : > { %v461_v33 = vpop.f32.mrb[2].mxu1 }
 0x1da   : > { %v615_v34 = vpop.f32.mrb[3].mxu1  ;;  %v465_v35 = vadd.f32 %v464_v29, %v459_v31 }
 0x1dc   : > { %v466_v36 = vsel %vm299_vm1, %v465_v35, 0.0 }
 0x1dd   : > { %467 = vadd.xlane.f32.xlu0 %v466_v36 }
 0x26a   : > { %v468_v37 = vpop.xlane.xlu0 %467 }
 0x26b   : > { %v470_v38 = vmul.f32 0.03125, %v468_v37 }
 0x26d   : > { %v471_v39 = vsub.f32 %v465_v35, %v470_v38 }
 0x26f   : > { %v472_v40 = vmul.f32 %v471_v39, %v471_v39 }
 0x271   : > { %v473_v41 = vsel %vm299_vm1, %v472_v40, 0.0 }
 0x272   : > { %474 = vadd.xlane.f32.xlu0 %v473_v41 }
 0x2ff   : > { %v475_v42 = vpop.xlane.xlu0 %474 }
 0x300   : > { %v476_v43 = vmul.f32 0.03125, %v475_v42 }
 0x302   : > { %v477_v44 = vadd.f32 1e-05, %v476_v43 }
 0x304   : > { %638 = vrsqrt.f32 %v477_v44 }
 0x30e   : > { %v639_v45 = vpop.eup %638 }
 0x30f   : > { %v479_v47 = vmul.f32 %v639_v45, %v471_v39 }
 0x311   : > { %v487_v49 = vmul.f32 %v572_v46, %v479_v47 }
 0x313   : > { %v495_v50 = vadd.f32 %v573_v48, %v487_v49 }
 0x315   : > { %v496_v51 = vpack.c.bf16 %v495_v50, %v495_v50 }
 0x317   : > { %498 = vst.msk [vmem:[%s273_s17] sm:$0xf] %vm497_vm2, %v496_v51 }
 0x318 PF: > { %s17_s24 = sadd.s32 1, %s646_s24  }
 0x319   : > { %p14_p4 = scmp.ge.s32.totalorder %s17_s24, 4  }
 0x31b   :  { %16 = sbr.rel (!%p14_p4) target bundleno = 1 (0x1), region = 78 }

// kernel: vit_forward.11
= control target key start
LH: loop header
LB: loop body
LE: loop exit
PB: predicated region body
PF: predicated region fallthrough
CT: control target
= control target key end

     0   :  { %vm24_vm0 = vcmask 254976   ;;  %s249_s0 = inlined_call_operand.vmem [shape: bf16[2,32], index: 0, kind: input, shape index: {}]   ;;  %s250_s1 = inlined_call_operand.vmem [shape: f32[1,32], index: 1, kind: input, shape index: {}]   ;;  %s251_s2 = inlined_call_operand.vmem [shape: f32[1,32], index: 2, kind: input, shape index: {}]   ;;  %s252_s3 = inlined_call_operand.vmem [shape: bf16[32,128], index: 3, kind: input, shape index: {}]   ;;  %s253_s4 = inlined_call_operand.vmem [shape: f32[1,128], index: 4, kind: input, shape index: {}]   ;;  %s254_s5 = inlined_call_operand.hbm [shape: f32[2,128], index: 5, kind: output, shape index: {}]  }
   0x1   :  { %v22_v0 = vld [vmem:[%s249_s0] sm:$0x1] }
   0x2   :  { %v23_v1 = vunpack.c.l.bf16 %v22_v0 }
   0x3   :  { %10 = vsyncpa [#allocation3], 0  ;;  %v158_v8 = vld [vmem:[%s252_s3] sm:$0xff]   ;;  %v186_v9 = vmov 0.0   ;;  %v159_v10 = vld [vmem:[%s252_s3 + $0x8] sm:$0xff]   ;;  %vm187_vm1 = vmmov 0  }
   0x4   :  { %v25_v2 = vsel %vm24_vm0, %v23_v1, 0.0  ;;  %147 = vmatprep.subr.bf16.mxu0 %v186_v9  ;;  %151 = vmatprep.mubr.msk.bf16.mxu0 %vm187_vm1, %v186_v9  ;;  %v138_v15 = vld [vmem:[%s250_s1] ss:$0 sm:$0xff]  ;;  %vm79_vm2 = vcmask 261120   ;;  %s188_s28 = smov [#allocation2]  }
   0x5   :  { %26 = vadd.xlane.f32.xlu0 %v25_v2  ;;  %148 = vmatpush3.bf16.msra.mxu0 %v158_v8  ;;  %v139_v17 = vld [vmem:[%s251_s2] ss:$0 sm:$0xff]  ;;  %s130_s29 = sshll.u32 %s188_s28, 4  ;;  %s131_s29 = int_to_ptr.vmem [resolvable:$true] %s130_s29 }
   0x6   :  { %149 = vmatprep.subr.bf16.mxu0 %v186_v9  ;;  %v140_v21 = vld [vmem:[%s253_s4] ss:$0 sm:$0xff]  ;;  %s162_s1 = scalar_lea.vmem %s131_s29, 32  ;;  %p167_p1 = scmp.lt.s32.totalorder %s131_s29, %s131_s29 }
   0x7   :  { %p163_p0 = scmp.ne.s32.totalorder %s131_s29, %s162_s1  ;;  %p168_p2 = scmp.lt.s32.totalorder %s162_s1, %s162_s1 }
   0x9   :  { %150 = vmatpush3.bf16.msra.mxu0 %v159_v10  ;;  %p169_p3 = por %p168_p2, %p167_p1 }
   0xb   :  { %p170_p4 = pnand %p169_p3, %p163_p0 }
  0x92   :  { %v27_v3 = vpop.xlane.xlu0 %26 }
  0x93   :  { %v29_v4 = vmul.f32 0.03125, %v27_v3 }
  0x95   :  { %v30_v5 = vsub.f32 %v23_v1, %v29_v4 }
  0x97   :  { %v31_v6 = vmul.f32 %v30_v5, %v30_v5 }
  0x99   :  { %v32_v7 = vsel %vm24_vm0, %v31_v6, 0.0 }
  0x9a   :  { %33 = vadd.xlane.f32.xlu0 %v32_v7 }
 0x127   :  { %v34_v11 = vpop.xlane.xlu0 %33 }
 0x128   :  { %v35_v12 = vmul.f32 0.03125, %v34_v11 }
 0x12a   :  { %v36_v13 = vadd.f32 1e-05, %v35_v12 }
 0x12c   :  { %160 = vrsqrt.f32 %v36_v13 }
 0x136   :  { %v161_v14 = vpop.eup %160 }
 0x137   :  { %v38_v16 = vmul.f32 %v161_v14, %v30_v5 }
 0x139   :  { %v46_v18 = vmul.f32 %v138_v15, %v38_v16 }
 0x13b   :  { %v54_v19 = vadd.f32 %v139_v17, %v46_v18 }
 0x13d   :  { %v55_v20 = vpack.c.bf16 %v54_v19, %v54_v19 }
 0x13f   :  { %152 = vmatmul.mubr.msk.bf16.vlgmr.msra.gmra.mrb[0].mxu0 %vm79_vm2, %v55_v20 }
 0x212   :  { %v117_v22 = vpop.f32.mrb[0].mxu0 }
 0x213   :  { %v118_v23 = vadd.f32 %v140_v21, %v117_v22  ;;  %v153_v24 = vpop.f32.mrb[1].mxu0 }
 0x214   :  { %v120_v25 = vpop.f32.mrb[2].mxu0 }
 0x215   :  { %123 = vst [vmem:[#allocation2] sm:$0x3] %v118_v23  ;;  %v154_v26 = vpop.f32.mrb[3].mxu0 }
 0x216   :  { %173 = shalt.err (!%p170_p4)
}
 0x217   :  { %s174_s4 = scalar_lea.hbm %s254_s5, 32 }
 0x218   :  { %p175_p5 = scmp.ne.s32.totalorder %s254_s5, %s174_s4  ;;  %p178_p6 = scmp.lt.u32.totalorder %s174_s4, %s254_s5 }
 0x21a   :  { %p180_p7 = pnand %p178_p6, %p175_p5 }
 0x21c   :  { %183 = shalt.err (!%p180_p7)
}
 0x21d   :  { %133 = dma.vmem_to_hbm [thread:$0]  %s131_s29, 32, %s254_s5, [#allocation3]  }
 0x21e   :  { %184 = dma.done.wait [#allocation3], 32  }
 0x21f   :  { %185 = vsyncadd [#allocation3], 4294967264 }
 0x220   :  { %137 = vsyncpa [#allocation3], 1 }

// kernel: vit_forward.7
= control target key start
LH: loop header
LB: loop body
LE: loop exit
PB: predicated region body
PF: predicated region fallthrough
CT: control target
= control target key end

     0   :  { %s1190_s24 = smov 0   ;;  %s1321_s0 = inlined_call_operand.vmem [shape: bf16[2,8,32], index: 0, kind: input, shape index: {}]   ;;  %s1322_s1 = inlined_call_operand.vmem [shape: bf16[32,96], index: 1, kind: input, shape index: {}]   ;;  %s1323_s2 = inlined_call_operand.vmem [shape: f32[1,96], index: 2, kind: input, shape index: {}]   ;;  %s1324_s3 = inlined_call_operand.vmem [shape: bf16[32,32], index: 3, kind: input, shape index: {}]   ;;  %s1325_s4 = inlined_call_operand.vmem [shape: f32[1,32], index: 4, kind: input, shape index: {}]   ;;  %s1326_s5 = inlined_call_operand.vmem [shape: f32[1,32], index: 5, kind: input, shape index: {}]   ;;  %s1327_s6 = inlined_call_operand.vmem [shape: f32[1,32], index: 6, kind: input, shape index: {}]   ;;  %s1328_s7 = inlined_call_operand.vmem [shape: bf16[2,8,32], index: 7, kind: output, shape index: {}]  }
   0x1 LB: > { %s967_s25 = sadd.s32 4294967295, %s1132_s24   ;;  %p971_p0 = scmp.ge.s32.totalorder %s1132_s24, 1  ;;  %s1132_s24 = sphi %s1190_s24, %s17_s24  }
   0x2   : > { %p236_p1 = scmp.lt.s32.totalorder %s1132_s24, 3 }
   0x4   : > { %p237_p2 = pnand %p971_p0, %p236_p1 }
   0x5   : > { %v1104_v0 = vld [vmem:[%s1322_s1] sm:$0xff] (!%p237_p2)   ;;  %v1134_v1 = vmov (!%p237_p2), 0.0   ;;  %v1105_v2 = vld [vmem:[%s1322_s1 + $0x8] sm:$0xff] (!%p237_p2)   ;;  %vm1135_vm0 = vmmov (!%p237_p2), 0   ;;  %p266_p3 = scmp.lt.s32.totalorder (!%p237_p2), %s967_s25, 1  ;;  %vm299_vm1 = vcmask (!%p237_p2), 261120   ;;  %v344_v22 = vlaneseq (!%p237_p2) }
   0x6   : > { %240 = sbr.rel (%p237_p2) target bundleno = 1809 (0x711), region = 48  ;;  %1016 = vmatprep.subr.bf16.mxu0 (!%p237_p2), %v1134_v1  ;;  %1024 = vmatprep.subr.bf16.mxu1 (!%p237_p2), %v1134_v1  ;;  %v974_v4 = vld [vmem:[%s1323_s2] ss:$0 sm:$0xff] (!%p237_p2)  ;;  %s1136_s13 = smov (!%p237_p2), 120   ;;  %vm350_vm2 = vcmask (!%p237_p2), 64512   ;;  %vm415_vm4 = vcmask (!%p237_p2), 1043456  }
   0x7   : > { %1017 = vmatpush3.bf16.msra.mxu0 (!%p237_p2), %v1104_v0  ;;  %1020 = vmatprep.mubr.msk.bf16.mxu0 (!%p237_p2), %vm1135_vm0, %v1134_v1  ;;  %s1137_s14 = smov (!%p237_p2), 96   ;;  %s1138_s15 = smov (!%p237_p2), 80   ;;  %v345_v23 = vand.u32 (!%p237_p2), 127, %v344_v22  ;;  %vm808_vm5 = vcmask (!%p237_p2), 130048   ;;  %vm811_vm6 = vcmask (!%p237_p2), 195584   ;;  %vm912_vm7 = vcmask (!%p237_p2), 257024  }
   0x8   : > { %1018 = vmatprep.subr.bf16.mxu0 (!%p237_p2), %v1134_v1  ;;  %1026 = vmatprep.mubr.msk.bf16.mxu1 (!%p237_p2), %vm1135_vm0, %v1134_v1  ;;  %s1139_s16 = smov (!%p237_p2), 88   ;;  %s1140_s17 = smov (!%p237_p2), 72  }
   0x9   : > { %s1141_s18 = smov (!%p237_p2), 112   ;;  %s1142_s19 = smov (!%p237_p2), 104   ;;  %vm346_vm3 = vcmp.lt.s32.totalorder (!%p237_p2), %v345_v23, 5 }
   0xa   : > { %s1143_s20 = smov (!%p237_p2), 56   ;;  %s1144_s21 = smov (!%p237_p2), 64  }
   0xb   : > { %1019 = vmatpush3.bf16.msra.mxu0 (!%p237_p2), %v1105_v2  ;;  %s1145_s22 = smov (!%p237_p2), 40   ;;  %s1146_s23 = smov (!%p237_p2), 48  }
   0xc   : > { %1030 = vmatprep.subr.bf16.mxu0 (!%p237_p2), %v1134_v1  ;;  %s1147_s26 = smov (!%p237_p2), 8   ;;  %s1148_s9 = smov (!%p237_p2), 16  }
   0xd   : > { %s1330_s25 = smov (!%p266_p3, %s967_s25), 1 }
   0xe   : > { %s972_s30 = sshll.u32 %s1330_s25, 2 }
   0xf   : > { %s269_s10 = scalar_lea.vmem %s1321_s0, %s972_s30 }
  0x10   : > { %v1220_v3 = vld [vmem:[%s269_s10] sm:$0xf]  ;;  %s1149_s10 = smov 24  }
  0x11   : > { %1021 = vmatmul.mubr.msk.bf16.vlgmr.msra.gmra.mrb[0].mxu0 %vm299_vm1, %v1220_v3 }
  0x12   : > { %1032 = vmatprep.mubr.msk.bf16.mxu0 %vm1135_vm0, %v1134_v1 }
  0xe4   : > { %v337_v5 = vpop.f32.mrb[0].mxu0 }
  0xe5   : > { %v338_v6 = vadd.f32 %v974_v4, %v337_v5  ;;  %v1022_v7 = vpop.f32.mrb[1].mxu0 }
  0xe6   : > { %v340_v8 = vpop.f32.mrb[2].mxu0 }
  0xe7   : > { %v1229_v9 = vpack.c.bf16 %v338_v6, %v338_v6  ;;  %v1023_v10 = vpop.f32.mrb[3].mxu0 }
  0xe9   : > { %460 = vrot.lane.b32.xlu1 %v1229_v9, %s1136_s13  ;;  %348 = vrot.lane.b32.xlu0 %v1229_v9, %s1137_s14 }
  0xed   : > { %574 = vrot.lane.b32.xlu1 %v1229_v9, %s1138_s15  ;;  %462 = vrot.lane.b32.xlu0 %v1229_v9, %s1139_s16 }
  0xf1   : > { %686 = vrot.lane.b32.xlu1 %v1229_v9, %s1140_s17  ;;  %572 = vrot.lane.b32.xlu0 %v1229_v9, %s1141_s18 }
  0xf5   : > { %684 = vrot.lane.b32.xlu0 %v1229_v9, %s1142_s19  ;;  %s273_s19 = scalar_lea.vmem %s1328_s7, %s972_s30 }
 0x15b   : > { %v349_v11 = vpop.permute.xlu0 %348  ;;  %v461_v14 = vpop.permute.xlu1 %460 }
 0x15c   : > { %v355_v12 = vsel %vm350_vm2, %v349_v11, 0 }
 0x15d   : > { %1025 = vmatpush3.bf16.xpose.msra.mxu1 %v355_v12 }
 0x15e   : > { %1036 = vmatprep.subr.bf16.mxu1 %v1134_v1 }
 0x15f   : > { %v463_v13 = vpop.permute.xlu0 %462  ;;  %v575_v16 = vpop.permute.xlu1 %574 }
 0x160   : > { %v468_v15 = vsel %vm350_vm2, %v463_v13, 0  ;;  %v580_v17 = vsel %vm350_vm2, %v575_v16, 0 }
 0x163   : > { %v687_v18 = vpop.permute.xlu1 %686  ;;  %v573_v19 = vpop.permute.xlu0 %572 }
 0x164   : > { %1027 = vmatmul.mubr.msk.bf16.vlgmr.msra.gmra.mrb[0].mxu1 %vm350_vm2, %v1229_v9  ;;  %v692_v20 = vsel %vm350_vm2, %v687_v18, 0 }
 0x165   : > { %1037 = vmatpush3.bf16.xpose.msra.mxu1 %v468_v15  ;;  %1038 = vmatprep.mubr.msk.bf16.mxu1 %vm1135_vm0, %v1134_v1 }
 0x166   : > { %1048 = vmatprep.subr.bf16.mxu1 %v1134_v1 }
 0x167   : > { %v685_v21 = vpop.permute.xlu0 %684 }
 0x16c   : > { %1039 = vmatmul.mubr.msk.bf16.vlgmr.msra.gmra.mrb[4].mxu1 %vm350_vm2, %v461_v14 }
 0x16d   : > { %1049 = vmatpush3.bf16.xpose.msra.mxu1 %v580_v17  ;;  %1050 = vmatprep.mubr.msk.bf16.mxu1 %vm1135_vm0, %v1134_v1 }
 0x16e   : > { %1060 = vmatprep.subr.bf16.mxu1 %v1134_v1 }
 0x174   : > { %1051 = vmatmul.mubr.msk.bf16.vlgmr.msra.gmra.mrb[8].mxu1 %vm350_vm2, %v573_v19 }
 0x175   : > { %1061 = vmatpush3.bf16.xpose.msra.mxu1 %v692_v20  ;;  %1062 = vmatprep.mubr.msk.bf16.mxu1 %vm1135_vm0, %v1134_v1 }
 0x176   : > { %1072 = vmatprep.subr.bf16.mxu1 %v1134_v1 }
 0x17c   : > { %1063 = vmatmul.mubr.msk.bf16.vlgmr.msra.gmra.mrb[12].mxu1 %vm350_vm2, %v685_v21 }
 0x17d   : > { %1076 = vmatprep.mubr.msk.bf16.mxu1 %vm1135_vm0, %v1134_v1 }
 0x237   : > { %v391_v24 = vpop.f32.mrb[0].mxu1 }
 0x238   : > { %v397_v25 = vsel %vm346_vm3, %v391_v24, -1e+30  ;;  %v1028_v26 = vpop.f32.mrb[1].mxu1 }
 0x239   : > { %v394_v27 = vpop.f32.mrb[2].mxu1  ;;  %v398_v28 = vsel %vm350_vm2, %v397_v25, -inf }
 0x23a   : > { %399 = vmax.xlane.f32.xlu1 %v398_v28  ;;  %v1029_v29 = vpop.f32.mrb[3].mxu1 }
 0x23f   : > { %v504_v30 = vpop.f32.mrb[4].mxu1 }
 0x240   : > { %v510_v31 = vsel %vm346_vm3, %v504_v30, -1e+30  ;;  %v1040_v32 = vpop.f32.mrb[5].mxu1 }
 0x241   : > { %v507_v33 = vpop.f32.mrb[6].mxu1  ;;  %v511_v34 = vsel %vm350_vm2, %v510_v31, -inf }
 0x242   : > { %512 = vmax.xlane.f32.xlu0 %v511_v34  ;;  %v1041_v35 = vpop.f32.mrb[7].mxu1 }
 0x247   : > { %v616_v36 = vpop.f32.mrb[8].mxu1 }
 0x248   : > { %v622_v37 = vsel %vm346_vm3, %v616_v36, -1e+30  ;;  %v1052_v38 = vpop.f32.mrb[9].mxu1 }
 0x249   : > { %v619_v39 = vpop.f32.mrb[10].mxu1  ;;  %v623_v40 = vsel %vm350_vm2, %v622_v37, -inf }
 0x24a   : > { %624 = vmax.xlane.f32.xlu0 %v623_v40  ;;  %v1053_v41 = vpop.f32.mrb[11].mxu1  ;;  %v1106_v39 = vld [vmem:[%s1324_s3] sm:$0xff]   ;;  %v1107_v40 = vld [vmem:[%s1324_s3 + $0x8] sm:$0xff]  }
 0x24b   : > { %1073 = vmatpush3.bf16.msra.mxu1 %v1106_v39 }
 0x24c   : > { %1074 = vmatprep.subr.bf16.mxu1 %v1134_v1 }
 0x24f   : > { %v728_v42 = vpop.f32.mrb[12].mxu1  ;;  %1075 = vmatpush3.bf16.msra.mxu1 %v1107_v40 }
 0x250   : > { %v734_v43 = vsel %vm346_vm3, %v728_v42, -1e+30  ;;  %v1064_v44 = vpop.f32.mrb[13].mxu1 }
 0x251   : > { %v731_v45 = vpop.f32.mrb[14].mxu1  ;;  %v735_v46 = vsel %vm350_vm2, %v734_v43, -inf }
 0x252   : > { %736 = vmax.xlane.f32.xlu1 %v735_v46  ;;  %v1065_v47 = vpop.f32.mrb[15].mxu1 }
 0x2c7   : > { %v400_v48 = vpop.xlane.xlu1 %399 }
 0x2c8   : > { %v401_v49 = vsub.f32 %v397_v25, %v400_v48 }
 0x2ca   : > { %v402_v50 = vmul.f32 1.442695, %v401_v49 }
 0x2cc   : > { %1108 = vpow2.f32 %v402_v50 }
 0x2cf   : > { %v513_v51 = vpop.xlane.xlu0 %512 }
 0x2d0   : > { %v514_v52 = vsub.f32 %v510_v31, %v513_v51 }
 0x2d2   : > { %v515_v53 = vmul.f32 1.442695, %v514_v52 }
 0x2d4   : > { %1110 = vpow2.f32 %v515_v53 }
 0x2d6   : > { %v1109_v54 = vpop.eup %1108 }
 0x2d7   : > { %v625_v55 = vpop.xlane.xlu0 %624  ;;  %v404_v56 = vsel %vm350_vm2, %v1109_v54, 0.0 }
 0x2d8   : > { %v626_v57 = vsub.f32 %v622_v37, %v625_v55  ;;  %405 = vadd.xlane.f32.xlu0 %v404_v56 }
 0x2da   : > { %v627_v58 = vmul.f32 1.442695, %v626_v57  ;;  %v986_v57 = vld [vmem:[%s1325_s4] ss:$0 sm:$0xff] }
 0x2dc   : > { %1112 = vpow2.f32 %v627_v58  ;;  %v879_v58 = vunpack.c.l.bf16 %v1220_v3 }
 0x2de   : > { %v1111_v59 = vpop.eup %1110 }
 0x2df   : > { %v517_v60 = vsel %vm350_vm2, %v1111_v59, 0.0  ;;  %v737_v63 = vpop.xlane.xlu1 %736 }
 0x2e0   : > { %518 = vadd.xlane.f32.xlu1 %v517_v60  ;;  %v738_v0 = vsub.f32 %v734_v43, %v737_v63 }
 0x2e2   : > { %v739_v2 = vmul.f32 1.442695, %v738_v0 }
 0x2e4   : > { %1114 = vpow2.f32 %v739_v2 }
 0x2e6   : > { %v1113_v61 = vpop.eup %1112 }
 0x2e7   : > { %v629_v62 = vsel %vm350_vm2, %v1113_v61, 0.0 }
 0x2e8   : > { %630 = vadd.xlane.f32.xlu0 %v629_v62 }
 0x2ee   : > { %v1115_v4 = vpop.eup %1114 }
 0x2ef   : > { %v741_v5 = vsel %vm350_vm2, %v1115_v4, 0.0 }
 0x2f1   : > { %523 = vrot.lane.b32.xlu1 %v1229_v9, %s1143_s20 }
 0x2fe   : > { %410 = vrot.lane.b32.xlu0 %v1229_v9, %s1144_s21 }
 0x302   : > { %747 = vrot.lane.b32.xlu0 %v1229_v9, %s1145_s22 }
 0x315   : > { %742 = vadd.xlane.f32.xlu1 %v741_v5 }
 0x326   : > { %635 = vrot.lane.b32.xlu1 %v1229_v9, %s1146_s23 }
 0x365   : > { %v406_v6 = vpop.xlane.xlu0 %405 }
 0x366   : > { %1116 = vrcp.f32 %v406_v6 }
 0x36d   : > { %v519_v7 = vpop.xlane.xlu1 %518 }
 0x36e   : > { %1118 = vrcp.f32 %v519_v7 }
 0x370   : > { %v1117_v8 = vpop.eup %1116 }
 0x371   : > { %v408_v11 = vmul.f32 %v1117_v8, %v1109_v54  ;;  %v524_v14 = vpop.permute.xlu1 %523 }
 0x372   : > { %v529_v17 = vsel %vm415_vm4, %v524_v14, 0 }
 0x373   : > { %v409_v15 = vpack.c.bf16 %v408_v11, %v408_v11 }
 0x375   : > { %v631_v10 = vpop.xlane.xlu0 %630 }
 0x376   : > { %1120 = vrcp.f32 %v631_v10 }
 0x378   : > { %v1119_v16 = vpop.eup %1118 }
 0x379   : > { %v411_v12 = vpop.permute.xlu0 %410  ;;  %v521_v9 = vmul.f32 %v1119_v16, %v1111_v59 }
 0x37a   : > { %v417_v13 = vsel %vm415_vm4, %v411_v12, 0 }
 0x37b   : > { %1031 = vmatpush3.bf16.msra.mxu0 %v417_v13  ;;  %v522_v18 = vpack.c.bf16 %v521_v9, %v521_v9  ;;  %v990_v13 = vld [vmem:[%s1326_s5] ss:$0 sm:$0xff] }
 0x37c   : > { %1042 = vmatprep.subr.bf16.mxu0 %v1134_v1 }
 0x37d   : > { %v748_v24 = vpop.permute.xlu0 %747 }
 0x37e   : > { %1033 = vmatmul.mubr.msk.bf16.vlgmr.msra.gmra.mrb[4].mxu0 %vm350_vm2, %v409_v15  ;;  %v753_v26 = vsel %vm415_vm4, %v748_v24, 0  ;;  %v991_v15 = vld [vmem:[%s1327_s6] ss:$0 sm:$0xff] }
 0x37f   : > { %1043 = vmatpush3.bf16.msra.mxu0 %v529_v17  ;;  %1044 = vmatprep.mubr.msk.bf16.mxu0 %vm1135_vm0, %v1134_v1 }
 0x380   : > { %1054 = vmatprep.subr.bf16.mxu0 %v1134_v1  ;;  %v1121_v19 = vpop.eup %1120 }
 0x381   : > { %v633_v21 = vmul.f32 %v1121_v19, %v1113_v61 }
 0x383   : > { %v634_v25 = vpack.c.bf16 %v633_v21, %v633_v21 }
 0x386   : > { %1045 = vmatmul.mubr.msk.bf16.vlgmr.msra.gmra.mrb[8].mxu0 %vm350_vm2, %v522_v18 }
 0x387   : > { %1056 = vmatprep.mubr.msk.bf16.mxu0 %vm1135_vm0, %v1134_v1 }
 0x3a2   : > { %v743_v20 = vpop.xlane.xlu1 %742 }
 0x3a3   : > { %1122 = vrcp.f32 %v743_v20 }
 0x3a6   : > { %v636_v22 = vpop.permute.xlu1 %635 }
 0x3a7   : > { %v641_v23 = vsel %vm415_vm4, %v636_v22, 0 }
 0x3a8   : > { %1055 = vmatpush3.bf16.msra.mxu0 %v641_v23 }
 0x3a9   : > { %1066 = vmatprep.subr.bf16.mxu0 %v1134_v1 }
 0x3ab   : > { %1057 = vmatmul.mubr.msk.bf16.vlgmr.msra.gmra.mrb[12].mxu0 %vm350_vm2, %v634_v25 }
 0x3ac   : > { %1067 = vmatpush3.bf16.msra.mxu0 %v753_v26  ;;  %1068 = vmatprep.mubr.msk.bf16.mxu0 %vm1135_vm0, %v1134_v1 }
 0x3ad   : > { %v1123_v27 = vpop.eup %1122 }
 0x3ae   : > { %v745_v28 = vmul.f32 %v1123_v27, %v1115_v4 }
 0x3b0   : > { %v746_v29 = vpack.c.bf16 %v745_v28, %v745_v28 }
 0x3b3   : > { %1069 = vmatmul.mubr.msk.bf16.vlgmr.msra.gmra.mrb[16].mxu0 %vm350_vm2, %v746_v29 }
 0x451   : > { %v453_v30 = vpop.f32.mrb[4].mxu0 }
 0x452   : > { %v1034_v31 = vpop.f32.mrb[5].mxu0  ;;  %v459_v52 = vpack.c.bf16 %v453_v30, %v453_v30 }
 0x453   : > { %v456_v32 = vpop.f32.mrb[6].mxu0 }
 0x454   : > { %v1035_v33 = vpop.f32.mrb[7].mxu0 }
 0x459   : > { %v565_v34 = vpop.f32.mrb[8].mxu0 }
 0x45a   : > { %v571_v35 = vpack.c.bf16 %v565_v34, %v565_v34  ;;  %v1046_v36 = vpop.f32.mrb[9].mxu0 }
 0x45b   : > { %v568_v37 = vpop.f32.mrb[10].mxu0 }
 0x45c   : > { %797 = vrot.lane.b32.xlu1 %v571_v35, %s1147_s26  ;;  %v1047_v38 = vpop.f32.mrb[11].mxu0 }
 0x47e   : > { %v677_v41 = vpop.f32.mrb[12].mxu0 }
 0x47f   : > { %v683_v42 = vpack.c.bf16 %v677_v41, %v677_v41  ;;  %v1058_v43 = vpop.f32.mrb[13].mxu0 }
 0x480   : > { %v680_v44 = vpop.f32.mrb[14].mxu0 }
 0x481   : > { %800 = vrot.lane.b32.xlu0 %v683_v42, %s1148_s9  ;;  %v1059_v45 = vpop.f32.mrb[15].mxu0 }
 0x486   : > { %v789_v46 = vpop.f32.mrb[16].mxu0 }
 0x487   : > { %v795_v47 = vpack.c.bf16 %v789_v46, %v789_v46  ;;  %v1070_v48 = vpop.f32.mrb[17].mxu0 }
 0x488   : > { %v792_v49 = vpop.f32.mrb[18].mxu0 }
 0x489   : > { %803 = vrot.lane.b32.xlu1 %v795_v47, %s1149_s10  ;;  %v1071_v50 = vpop.f32.mrb[19].mxu0 }
 0x4ce   : > { %v798_v51 = vpop.permute.xlu1 %797 }
 0x4cf   : > { %v807_v1 = vsel %vm350_vm2, %v459_v52, %v798_v51 }
 0x4f3   : > { %v801_v53 = vpop.permute.xlu0 %800 }
 0x4f4   : > { %v810_v54 = vsel %vm808_vm5, %v807_v1, %v801_v53 }
 0x4fb   : > { %v804_v55 = vpop.permute.xlu1 %803 }
 0x4fc   : > { %v813_v56 = vsel %vm811_vm6, %v810_v54, %v804_v55 }
 0x4fd   : > { %1077 = vmatmul.mubr.msk.bf16.vlgmr.msra.gmra.mrb[16].mxu1 %vm299_vm1, %v813_v56 }
 0x5d0   : > { %v873_v59 = vpop.f32.mrb[16].mxu1 }
 0x5d1   : > { %v874_v60 = vadd.f32 %v986_v57, %v873_v59  ;;  %v1078_v61 = vpop.f32.mrb[17].mxu1 }
 0x5d2   : > { %v876_v62 = vpop.f32.mrb[18].mxu1 }
 0x5d3   : > { %v1079_v63 = vpop.f32.mrb[19].mxu1  ;;  %v880_v0 = vadd.f32 %v879_v58, %v874_v60 }
 0x5d5   : > { %v881_v2 = vsel %vm299_vm1, %v880_v0, 0.0 }
 0x5d6   : > { %882 = vadd.xlane.f32.xlu0 %v881_v2 }
 0x663   : > { %v883_v4 = vpop.xlane.xlu0 %882 }
 0x664   : > { %v885_v5 = vmul.f32 0.03125, %v883_v4 }
 0x666   : > { %v886_v6 = vsub.f32 %v880_v0, %v885_v5 }
 0x668   : > { %v887_v7 = vmul.f32 %v886_v6, %v886_v6 }
 0x66a   : > { %v888_v8 = vsel %vm299_vm1, %v887_v7, 0.0 }
 0x66b   : > { %889 = vadd.xlane.f32.xlu1 %v888_v8 }
 0x6f8   : > { %v890_v10 = vpop.xlane.xlu1 %889 }
 0x6f9   : > { %v891_v11 = vmul.f32 0.03125, %v890_v10 }
 0x6fb   : > { %v892_v3 = vadd.f32 1e-05, %v891_v11 }
 0x6fd   : > { %1124 = vrsqrt.f32 %v892_v3 }
 0x707   : > { %v1125_v12 = vpop.eup %1124 }
 0x708   : > { %v894_v14 = vmul.f32 %v1125_v12, %v886_v6 }
 0x70a   : > { %v902_v16 = vmul.f32 %v990_v13, %v894_v14 }
 0x70c   : > { %v910_v17 = vadd.f32 %v991_v15, %v902_v16 }
 0x70e   : > { %v911_v9 = vpack.c.bf16 %v910_v17, %v910_v17 }
 0x710   : > { %913 = vst.msk [vmem:[%s273_s19] sm:$0xf] %vm912_vm7, %v911_v9 }
 0x711 PF: > { %s17_s24 = sadd.s32 1, %s1132_s24  }
 0x712   : > { %p14_p4 = scmp.ge.s32.totalorder %s17_s24, 4  }
 0x714   :  { %16 = sbr.rel (!%p14_p4) target bundleno = 1 (0x1), region = 78 }

</bundles_post_ra>
